<compile_context>
chip_gen: v7x
topology: tpu7x:2x2x1
jax: 0.10.0
libtpu: 0.0.40
codegen_flags: <defaults>
</compile_context>

<pallas_src>
import jax
import jax.numpy as jnp
from jax.experimental import pallas as pl
from jax.experimental.pallas import tpu as pltpu


def convnet_kernel(params_ref, x_rows_ref, x_cols_ref, out_ref):
    # params_ref (SMEM, f32[10]):
    #   [0:4] conv1 plane weights w[c_in, kd]   (out=1, in=2, kD=2, kH=kW=1)
    #   [4:6] conv2H weights (kernel (1,2)), [6] conv2H bias (conv1 bias folded in)
    #   [7:9] conv2V weights (kernel (2,1)), [9] conv2V bias (conv1 bias folded in)
    # x_rows_ref: (2, 2, T, W)  row strip of x
    # x_cols_ref: (2, 2, H, T)  column strip of x
    # out_ref:    (2, T, W)     row strip of the (lane-padded) output
    w00 = params_ref[0]
    w01 = params_ref[1]
    w10 = params_ref[2]
    w11 = params_ref[3]
    wh0 = params_ref[4]
    wh1 = params_ref[5]
    bh = params_ref[6]
    wv0 = params_ref[7]
    wv1 = params_ref[8]
    bv = params_ref[9]

    # ---- channel 0: conv1 + horizontal (1,2) conv on the row strip ------------
    o1r = (x_rows_ref[0, 0] * w00 + x_rows_ref[0, 1] * w01
           + x_rows_ref[1, 0] * w10 + x_rows_ref[1, 1] * w11)            # (T, W)
    # shift-left-by-one along lanes (gives o1r[:, j+1]); wrapped last column is junk
    o1r_next = jnp.concatenate([o1r[:, 1:], o1r[:, :1]], axis=1)
    out_ref[0] = o1r * wh0 + o1r_next * wh1 + bh                         # col W-1 junk

    # ---- channel 1: conv1 + vertical (2,1) conv on the column strip ------------
    # Transpose the full (H, T) tile (tile-aligned) so the store stays a
    # lane-dense row strip of the transposed output.
    o1c = (x_cols_ref[0, 0] * w00 + x_cols_ref[0, 1] * w01
           + x_cols_ref[1, 0] * w10 + x_cols_ref[1, 1] * w11)            # (H, T)
    o1t = jnp.transpose(o1c)                                             # (T, H)
    o1t_next = jnp.concatenate([o1t[:, 1:], o1t[:, :1]], axis=1)
    out_ref[1] = o1t * wv0 + o1t_next * wv1 + bv                         # col H-1 (=W-1) junk


@jax.jit
def convnet_forward(x, params):
    """x: f32 (2, 2, H, W) with H == W.  Returns f32 (1, 2, H, W-1)."""
    C, D, H, W = x.shape
    assert C == 2 and D == 2 and H == W, "reference model requires (2, 2, H, H) input"

    # Fold the conv1 bias into the branch biases (removes one broadcast-add/elem).
    p = params
    kparams = jnp.stack([
        p[0], p[1], p[2], p[3],
        p[5], p[6], p[4] * (p[5] + p[6]) + p[7],
        p[8], p[9], p[4] * (p[8] + p[9]) + p[10],
    ]).astype(jnp.float32)

    # Tile: multiple of 128 (lane tile for the column strip / aligned transpose),
    # or the full extent for tiny inputs.
    T = H if H <= 128 else 128
    nt = pl.cdiv(H, T)
    # double-buffered per-step bytes: row strip + column strip + output strip (f32)
    step_bytes = 2 * (16 * T * W + 16 * H * T + 8 * T * W)
    vmem_limit = int(min(48 << 20, max(2 * step_bytes, 16 << 20)))

    out = pl.pallas_call(
        convnet_kernel,
        out_shape=jax.ShapeDtypeStruct((2, H, W), jnp.float32),  # lane-dense (W-1 -> W)
        grid=(nt,),
        in_specs=[
            pl.BlockSpec(memory_space=pltpu.MemorySpace.SMEM),        # scalar params
            pl.BlockSpec((2, 2, T, W), lambda i: (0, 0, i, 0)),       # x row strip
            pl.BlockSpec((2, 2, H, T), lambda i: (0, 0, 0, i)),       # x column strip
        ],
        out_specs=pl.BlockSpec((2, T, W), lambda i: (0, i, 0)),
        compiler_params=pltpu.CompilerParams(
            dimension_semantics=("parallel",),   # v7x: split row tiles across both TCs
            vmem_limit_bytes=vmem_limit,
        ),
    )(kparams, x, x)

    # Drop the padded junk column; add the leading dim torch.cat(..., dim=1) implies.
    return out[None, :, :, : W - 1]


def init_params(key):
    """Deterministic init mimicking PyTorch's default U(-1/sqrt(fan_in), +)."""
    k1, k2, k3, k4, k5, k6 = jax.random.split(key, 6)
    b1 = 1.0 / jnp.sqrt(4.0)   # conv1 fan_in = 2*2*1*1
    b2 = 1.0 / jnp.sqrt(2.0)   # conv2H/V fan_in = 1*1*2
    w1 = jax.random.uniform(k1, (4,), jnp.float32, -b1, b1)   # conv1 weight [c,kd]
    bb1 = jax.random.uniform(k2, (1,), jnp.float32, -b1, b1)  # conv1 bias
    wh = jax.random.uniform(k3, (2,), jnp.float32, -b2, b2)   # conv2H weight
    bh = jax.random.uniform(k4, (1,), jnp.float32, -b2, b2)   # conv2H bias
    wv = jax.random.uniform(k5, (2,), jnp.float32, -b2, b2)   # conv2V weight
    bv = jax.random.uniform(k6, (1,), jnp.float32, -b2, b2)   # conv2V bias
    return jnp.concatenate([w1, bb1, wh, bh, wv, bv]).astype(jnp.float32)


def convnet_ref(x, p):
    """Pure-JAX reference (same math as the PyTorch module, original params)."""
    o1 = (x[0, 0] * p[0] + x[0, 1] * p[1] + x[1, 0] * p[2] + x[1, 1] * p[3] + p[4])
    out_h = o1[:, :-1] * p[5] + o1[:, 1:] * p[6] + p[7]
    out_v = o1[:-1, :] * p[8] + o1[1:, :] * p[9] + p[10]
    return jnp.stack([out_h, out_v.T], axis=0)[None]


if __name__ == "__main__":
    key = jax.random.PRNGKey(0)
    kx, kp = jax.random.split(key)

    H = W = 256  # small stand-in (exercises the 2-tile grid path); real grid is 100x100
    x = jax.random.normal(kx, (2, 2, H, W), dtype=jnp.float32)
    params = init_params(kp)

    out = jax.block_until_ready(convnet_forward(x, params))

    ref = convnet_ref(x, params)
    assert out.shape == (1, 2, H, W - 1), out.shape
    assert jnp.allclose(out, ref, atol=1e-5, rtol=1e-5), "mismatch vs JAX reference"

    print("KERNEL_OK")
</pallas_src>

<mosaic_0001>
module attributes {stable_mosaic.version = 11 : i64} {
  func.func @convnet_kernel(%arg0: i32, %arg1: memref<10xf32, #tpu.memory_space<smem>>, %arg2: memref<2x2x128x256xf32, #tpu.memory_space<vmem>>, %arg3: memref<2x2x256x128xf32, #tpu.memory_space<vmem>>, %arg4: memref<2x128x256xf32, #tpu.memory_space<vmem>>) attributes {dimension_semantics = [#tpu.dimension_semantics<parallel>], iteration_bounds = array<i64: 2>, scalar_prefetch = 0 : i64, scratch_operands = 0 : i64, tpu.core_type = #tpu.core_type<tc>, window_params = [{transform_indices = @transform_0, window_bounds = array<i64: 10>}, {transform_indices = @transform_1, window_bounds = array<i64: 2, 2, 128, 256>}, {transform_indices = @transform_2, window_bounds = array<i64: 2, 2, 256, 128>}, {transform_indices = @transform_3, window_bounds = array<i64: 2, 128, 256>}]} {
    %c0 = arith.constant 0 : index
    %0 = memref.load %arg1[%c0] : memref<10xf32, #tpu.memory_space<smem>>
    %c1 = arith.constant 1 : index
    %1 = memref.load %arg1[%c1] : memref<10xf32, #tpu.memory_space<smem>>
    %c2 = arith.constant 2 : index
    %2 = memref.load %arg1[%c2] : memref<10xf32, #tpu.memory_space<smem>>
    %c3 = arith.constant 3 : index
    %3 = memref.load %arg1[%c3] : memref<10xf32, #tpu.memory_space<smem>>
    %c4 = arith.constant 4 : index
    %4 = memref.load %arg1[%c4] : memref<10xf32, #tpu.memory_space<smem>>
    %c5 = arith.constant 5 : index
    %5 = memref.load %arg1[%c5] : memref<10xf32, #tpu.memory_space<smem>>
    %c6 = arith.constant 6 : index
    %6 = memref.load %arg1[%c6] : memref<10xf32, #tpu.memory_space<smem>>
    %c7 = arith.constant 7 : index
    %7 = memref.load %arg1[%c7] : memref<10xf32, #tpu.memory_space<smem>>
    %c8 = arith.constant 8 : index
    %8 = memref.load %arg1[%c8] : memref<10xf32, #tpu.memory_space<smem>>
    %c9 = arith.constant 9 : index
    %9 = memref.load %arg1[%c9] : memref<10xf32, #tpu.memory_space<smem>>
    %c0_0 = arith.constant 0 : index
    %c0_1 = arith.constant 0 : index
    %c0_2 = arith.constant 0 : index
    %c0_3 = arith.constant 0 : index
    %10 = vector.load %arg2[%c0_0, %c0_1, %c0_2, %c0_3] : memref<2x2x128x256xf32, #tpu.memory_space<vmem>>, vector<1x1x128x256xf32>
    %11 = vector.shape_cast %10 : vector<1x1x128x256xf32> to vector<128x256xf32>
    %12 = vector.broadcast %0 : f32 to vector<128x256xf32>
    %13 = arith.mulf %11, %12 : vector<128x256xf32>
    %c0_4 = arith.constant 0 : index
    %c1_5 = arith.constant 1 : index
    %c0_6 = arith.constant 0 : index
    %c0_7 = arith.constant 0 : index
    %14 = vector.load %arg2[%c0_4, %c1_5, %c0_6, %c0_7] : memref<2x2x128x256xf32, #tpu.memory_space<vmem>>, vector<1x1x128x256xf32>
    %15 = vector.shape_cast %14 : vector<1x1x128x256xf32> to vector<128x256xf32>
    %16 = vector.broadcast %1 : f32 to vector<128x256xf32>
    %17 = arith.mulf %15, %16 : vector<128x256xf32>
    %18 = arith.addf %13, %17 : vector<128x256xf32>
    %c1_8 = arith.constant 1 : index
    %c0_9 = arith.constant 0 : index
    %c0_10 = arith.constant 0 : index
    %c0_11 = arith.constant 0 : index
    %19 = vector.load %arg2[%c1_8, %c0_9, %c0_10, %c0_11] : memref<2x2x128x256xf32, #tpu.memory_space<vmem>>, vector<1x1x128x256xf32>
    %20 = vector.shape_cast %19 : vector<1x1x128x256xf32> to vector<128x256xf32>
    %21 = vector.broadcast %2 : f32 to vector<128x256xf32>
    %22 = arith.mulf %20, %21 : vector<128x256xf32>
    %23 = arith.addf %18, %22 : vector<128x256xf32>
    %c1_12 = arith.constant 1 : index
    %c1_13 = arith.constant 1 : index
    %c0_14 = arith.constant 0 : index
    %c0_15 = arith.constant 0 : index
    %24 = vector.load %arg2[%c1_12, %c1_13, %c0_14, %c0_15] : memref<2x2x128x256xf32, #tpu.memory_space<vmem>>, vector<1x1x128x256xf32>
    %25 = vector.shape_cast %24 : vector<1x1x128x256xf32> to vector<128x256xf32>
    %26 = vector.broadcast %3 : f32 to vector<128x256xf32>
    %27 = arith.mulf %25, %26 : vector<128x256xf32>
    %28 = arith.addf %23, %27 : vector<128x256xf32>
    %29 = vector.extract_strided_slice %28 {offsets = [0, 1], sizes = [128, 255], strides = [1, 1]} : vector<128x256xf32> to vector<128x255xf32>
    %30 = vector.extract_strided_slice %28 {offsets = [0, 0], sizes = [128, 1], strides = [1, 1]} : vector<128x256xf32> to vector<128x1xf32>
    %31 = tpu.concatenate %29, %30 in 1 : vector<128x255xf32>, vector<128x1xf32> -> vector<128x256xf32>
    %32 = vector.broadcast %4 : f32 to vector<128x256xf32>
    %33 = arith.mulf %28, %32 : vector<128x256xf32>
    %34 = vector.broadcast %5 : f32 to vector<128x256xf32>
    %35 = arith.mulf %31, %34 : vector<128x256xf32>
    %36 = arith.addf %33, %35 : vector<128x256xf32>
    %37 = vector.broadcast %6 : f32 to vector<128x256xf32>
    %38 = arith.addf %36, %37 : vector<128x256xf32>
    %c0_16 = arith.constant 0 : index
    %c0_17 = arith.constant 0 : index
    %c0_18 = arith.constant 0 : index
    %39 = vector.load %arg4[%c0_16, %c0_17, %c0_18] : memref<2x128x256xf32, #tpu.memory_space<vmem>>, vector<1x128x256xf32>
    %40 = vector.shape_cast %39 : vector<1x128x256xf32> to vector<128x256xf32>
    %41 = vector.shape_cast %38 : vector<128x256xf32> to vector<1x128x256xf32>
    tpu.vector_store %arg4[%c0_16, %c0_17, %c0_18], %41 {strides = array<i32>} : memref<2x128x256xf32, #tpu.memory_space<vmem>>, vector<1x128x256xf32>,
    %c0_19 = arith.constant 0 : index
    %c0_20 = arith.constant 0 : index
    %c0_21 = arith.constant 0 : index
    %c0_22 = arith.constant 0 : index
    %42 = vector.load %arg3[%c0_19, %c0_20, %c0_21, %c0_22] : memref<2x2x256x128xf32, #tpu.memory_space<vmem>>, vector<1x1x256x128xf32>
    %43 = vector.shape_cast %42 : vector<1x1x256x128xf32> to vector<256x128xf32>
    %44 = vector.broadcast %0 : f32 to vector<256x128xf32>
    %45 = arith.mulf %43, %44 : vector<256x128xf32>
    %c0_23 = arith.constant 0 : index
    %c1_24 = arith.constant 1 : index
    %c0_25 = arith.constant 0 : index
    %c0_26 = arith.constant 0 : index
    %46 = vector.load %arg3[%c0_23, %c1_24, %c0_25, %c0_26] : memref<2x2x256x128xf32, #tpu.memory_space<vmem>>, vector<1x1x256x128xf32>
    %47 = vector.shape_cast %46 : vector<1x1x256x128xf32> to vector<256x128xf32>
    %48 = vector.broadcast %1 : f32 to vector<256x128xf32>
    %49 = arith.mulf %47, %48 : vector<256x128xf32>
    %50 = arith.addf %45, %49 : vector<256x128xf32>
    %c1_27 = arith.constant 1 : index
    %c0_28 = arith.constant 0 : index
    %c0_29 = arith.constant 0 : index
    %c0_30 = arith.constant 0 : index
    %51 = vector.load %arg3[%c1_27, %c0_28, %c0_29, %c0_30] : memref<2x2x256x128xf32, #tpu.memory_space<vmem>>, vector<1x1x256x128xf32>
    %52 = vector.shape_cast %51 : vector<1x1x256x128xf32> to vector<256x128xf32>
    %53 = vector.broadcast %2 : f32 to vector<256x128xf32>
    %54 = arith.mulf %52, %53 : vector<256x128xf32>
    %55 = arith.addf %50, %54 : vector<256x128xf32>
    %c1_31 = arith.constant 1 : index
    %c1_32 = arith.constant 1 : index
    %c0_33 = arith.constant 0 : index
    %c0_34 = arith.constant 0 : index
    %56 = vector.load %arg3[%c1_31, %c1_32, %c0_33, %c0_34] : memref<2x2x256x128xf32, #tpu.memory_space<vmem>>, vector<1x1x256x128xf32>
    %57 = vector.shape_cast %56 : vector<1x1x256x128xf32> to vector<256x128xf32>
    %58 = vector.broadcast %3 : f32 to vector<256x128xf32>
    %59 = arith.mulf %57, %58 : vector<256x128xf32>
    %60 = arith.addf %55, %59 : vector<256x128xf32>
    %61 = tpu.transpose %60, [1, 0] : vector<256x128xf32> -> vector<128x256xf32>
    %62 = vector.extract_strided_slice %61 {offsets = [0, 1], sizes = [128, 255], strides = [1, 1]} : vector<128x256xf32> to vector<128x255xf32>
    %63 = vector.extract_strided_slice %61 {offsets = [0, 0], sizes = [128, 1], strides = [1, 1]} : vector<128x256xf32> to vector<128x1xf32>
    %64 = tpu.concatenate %62, %63 in 1 : vector<128x255xf32>, vector<128x1xf32> -> vector<128x256xf32>
    %65 = vector.broadcast %7 : f32 to vector<128x256xf32>
    %66 = arith.mulf %61, %65 : vector<128x256xf32>
    %67 = vector.broadcast %8 : f32 to vector<128x256xf32>
    %68 = arith.mulf %64, %67 : vector<128x256xf32>
    %69 = arith.addf %66, %68 : vector<128x256xf32>
    %70 = vector.broadcast %9 : f32 to vector<128x256xf32>
    %71 = arith.addf %69, %70 : vector<128x256xf32>
    %c1_35 = arith.constant 1 : index
    %c0_36 = arith.constant 0 : index
    %c0_37 = arith.constant 0 : index
    %72 = vector.load %arg4[%c1_35, %c0_36, %c0_37] : memref<2x128x256xf32, #tpu.memory_space<vmem>>, vector<1x128x256xf32>
    %73 = vector.shape_cast %72 : vector<1x128x256xf32> to vector<128x256xf32>
    %74 = vector.shape_cast %71 : vector<128x256xf32> to vector<1x128x256xf32>
    tpu.vector_store %arg4[%c1_35, %c0_36, %c0_37], %74 {strides = array<i32>} : memref<2x128x256xf32, #tpu.memory_space<vmem>>, vector<1x128x256xf32>,
    return
  }
  func.func @transform_0(%arg0: i32) -> i32 {
    %c0_i32 = arith.constant 0 : i32
    %c0_i32_0 = arith.constant 0 : i32
    return %c0_i32 : i32
  }
  func.func @transform_1(%arg0: i32) -> (i32, i32, i32, i32) {
    %c0_i32 = arith.constant 0 : i32
    %c0_i32_0 = arith.constant 0 : i32
    %c0_i32_1 = arith.constant 0 : i32
    %c0_i32_2 = arith.constant 0 : i32
    return %c0_i32, %c0_i32_0, %arg0, %c0_i32_1 : i32, i32, i32, i32
  }
  func.func @transform_2(%arg0: i32) -> (i32, i32, i32, i32) {
    %c0_i32 = arith.constant 0 : i32
    %c0_i32_0 = arith.constant 0 : i32
    %c0_i32_1 = arith.constant 0 : i32
    %c0_i32_2 = arith.constant 0 : i32
    return %c0_i32, %c0_i32_0, %c0_i32_1, %arg0 : i32, i32, i32, i32
  }
  func.func @transform_3(%arg0: i32) -> (i32, i32, i32) {
    %c0_i32 = arith.constant 0 : i32
    %c0_i32_0 = arith.constant 0 : i32
    %c0_i32_1 = arith.constant 0 : i32
    return %c0_i32, %arg0, %c0_i32_0 : i32, i32, i32
  }
}

</mosaic_0001>

<bundles_post_ra>
// kernel: convnet_forward.1
= control target key start
LH: loop header
LB: loop body
LE: loop exit
PB: predicated region body
PF: predicated region fallthrough
CT: control target
= control target key end

     0   :  { %8 = vsyncpa [#allocation4], 0  ;;  %s3919_s0 = inlined_call_operand.vmem [shape: f32[10], index: 0, kind: input, shape index: {}]   ;;  %s3920_s1 = inlined_call_operand.hbm [shape: f32[2,2,256,256], index: 1, kind: input, shape index: {}, may-alias: {1,2}]   ;;  %s3921_s2 = inlined_call_operand.hbm [shape: f32[2,2,256,256], index: 2, kind: input, shape index: {}, may-alias: {1,2}]   ;;  %s3922_s3 = inlined_call_operand.vmem [shape: f32[2,256,256], index: 3, kind: output, shape index: {}]  }
   0x1   :  { %9 = vsyncpa [#allocation3], 0 }
   0x2   :  { %11 = vsyncpa [#allocation3 + $0x1], 0 }
   0x3   :  { %12 = vsyncpa [#allocation7], 0 }
   0x4   :  { %14 = vsyncpa [#allocation7 + $0x1], 0  ;;  %s2426_s12 = smov 0   ;;  %s2428_s13 = smov 0  }
   0x5   :  { %s2430_s14 = smov 0   ;;  %s2432_s15 = smov 0  }
   0x6 LB: > { %s2445_s16 = sadd.s32 4294967295, %s2393_s15   ;;  %s2448_s17 = sadd.s32 1, %s2393_s15   ;;  %s2393_s15 = sphi %s2432_s15, %s3987_s15   ;;  %s2389_s14 = sphi %s2430_s14, %s3986_s14   ;;  %s2385_s13 = sphi %s2428_s13, %s3985_s13   ;;  %s2381_s12 = sphi %s2426_s12, %s3984_s12  }
   0x7   : > { %s45_s18 = ssub.s32 %s2393_s15, %s2448_s17  ;;  %s48_s19 = sadd.s32 1, %s2389_s14 }
   0x8   : > { %p46_p0 = scmp.eq.s32.totalorder %s45_s18, 0  ;;  %p55_p1 = scmp.ne.s32.totalorder %s2389_s14, %s2385_s13 }
   0x9   : > { %p56_p2 = scmp.eq.s32.totalorder %s2393_s15, 0  ;;  %p61_p3 = scmp.ne.s32.totalorder %s2385_s13, %s2381_s12 }
   0xa   : > { %s2458_s20 = scalar_select %p46_p0, %s2389_s14, %s48_s19  }
   0xb   : > { %p2460_p4 = por %p56_p2, %p55_p1  ;;  %p3924_p5 = scmp.eq.s32.totalorder %s2445_s16, 0 }
   0xc   : > { %p111_p6 = scmp.eq.s32.totalorder %s2445_s16, 1  ;;  %p1986_p7 = scmp.ge.s32.totalorder %s2393_s15, 1 }
   0xd   : > { %p2469_p8 = por %p3924_p5, %p61_p3  ;;  %p124_p9 = scmp.lt.s32.totalorder %s2393_s15, 3 }
   0xe   : > { %p2474_p10 = por %p111_p6, %p55_p1  ;;  %s137_s27 = sshll.u32 %s3919_s0, 4  ;;  %s138_s27 = int_to_ptr.vmem [resolvable:$true] %s137_s27 }
   0xf   : > { %s3943_s22 = scalar_select %p2469_p8, 1, 0 }
  0x10   : > { %s3944_s23 = scalar_select %p2474_p10, 1, 0 }
  0x11   : > { %p2478_p11 = pnand %p1986_p7, %p124_p9  ;;  %s2308_s28 = scalar_lea.vmem %s138_s27, 16 }
  0x12   : > { %p2309_p0 = scmp.ne.s32.totalorder %s138_s27, %s2308_s28  ;;  %p2316_p6 = scmp.lt.s32.totalorder %s138_s27, %s138_s27 }
  0x13   : > { %p2260_p12 = pneg %p2478_p11  ;;  %p2317_p7 = scmp.lt.s32.totalorder %s2308_s28, %s2308_s28 }
  0x15   : > { %p2261_p13 = pnand %p2260_p12, %p3924_p5  ;;  %p2318_p9 = por %p2317_p7, %p2316_p6 }
  0x17   : > { %p2310_p1 = pneg %p2261_p13 }
  0x19   : > { %p2311_p2 = pnand %p2310_p1, %p2309_p0 }
  0x1b   : > { %p2312_p3 = pneg %p2311_p2 }
  0x1d   : > { %p2319_p10 = pnand %p2318_p9, %p2312_p3 }
  0x1f   : > { %2322 = shalt.err (!%p2319_p10)
}
  0x20   : > { %s2395_s29 = smov [#allocation2]   ;;  %p1988_p8 = scmp.ge.s32.totalorder %s2393_s15, 2 }
  0x21   : > { %2263 = dma.vmem_to_smem (!%p2261_p13), %s138_s27, 16, %s2395_s29, [#allocation4]  }
  0x22   : > { %144 = sbr.rel (%p1988_p8) target bundleno = 80 (0x50), region = 20 }
  0x29   : > { %s2491_s30 = sand.u32 1, %s2389_s14   ;;  %s2242_s5 = sshll.u32 %s2393_s15, 12 }
  0x2a   : > { %s1989_s4 = sshll.u32 %s2491_s30, 10  ;;  %s159_s9 = scalar_lea.hbm %s3920_s1, %s2242_s5 }
  0x2b   : > { %s2247_s6 = scalar_select %p2460_p4, [#allocation0], [#allocation11] }
  0x2c   : > { %s152_s11 = scalar_lea.vmem [#allocation5], %s1989_s4  ;;  %s2396_s18 = smov 8192  }
  0x2d   : > { %s164_s10 = sld [smem:[%s2247_s6]]   ;;  %s172_s12 = sshll.u32 %s152_s11, 4  ;;  %s173_s12 = int_to_ptr.vmem [resolvable:$true] %s172_s12 }
  0x2e   : > { %2248 = sst [smem:[#allocation10]] (%p2460_p4), %s2396_s18  ;;  %s2397_s19 = smov 4096  }
  0x2f   : > { %2249 = sst [smem:[#allocation10 + $0x1]] (%p2460_p4), %s2397_s19  ;;  %s2398_s25 = smov 16  }
  0x30   : > { %2250 = sst [smem:[#allocation10 + $0x2]] (%p2460_p4), %s2398_s25  ;;  %s2399_s26 = smov 256  }
  0x31   : > { %2251 = sst [smem:[#allocation10 + $0x3]] (%p2460_p4), %s2399_s26  ;;  %s149_s29 = scalar_lea.sflag [#allocation3], %s2491_s30 }
  0x32   : > { %2252 = sst [smem:[#allocation10 + $0x4]] (%p2460_p4), %s2399_s26  ;;  %s2400_s5 = smov [#allocation9]  }
  0x33   : > { %s1993_s27 = sshll.u32 %s164_s10, 26  ;;  %2253 = sst [smem:[#allocation10 + $0x5]] (%p2460_p4), %s2398_s25 }
  0x34   : > { %s1994_s28 = sadd.s32 134217728, %s1993_s27  ;;  %s1996_s6 = sshll.u32 %s2393_s15, 7 }
  0x35   : > { %2254 = dma.general (%p2460_p4), %s159_s9, 16384, %s173_s12, %s149_s29, %s2400_s5, [#allocation10], %s1994_s28, 0  }
  0x36   : > { %s199_s7 = scalar_lea.vmem [#allocation6], %s1989_s4  ;;  %s2519_s19 = scalar_lea.hbm %s3921_s2, %s1996_s6 }
  0x37   : > { %s205_s8 = sshll.u32 %s199_s7, 4  ;;  %s196_s10 = scalar_lea.sflag [#allocation7], %s2491_s30  ;;  %s2521_s8 = int_to_ptr.vmem [resolvable:$true] %s205_s8 }
  0x38   : > { %s2323_s25 = scalar_lea.hbm %s2519_s19, 16384  ;;  %s2327_s9 = scalar_lea.hbm %s3921_s2, 32768 }
  0x39   : > { %p2324_p8 = scmp.ne.s32.totalorder %s2519_s19, %s2323_s25  ;;  %p2328_p13 = scmp.lt.u32.totalorder %s2519_s19, %s3921_s2 }
  0x3a   : > { %p2329_p0 = scmp.lt.u32.totalorder %s2327_s9, %s2323_s25  ;;  %p2331_p2 = scmp.lt.u32.totalorder %s2323_s25, %s2519_s19 }
  0x3b   : > { %p2325_p10 = pnand %p2324_p8, %p2460_p4 }
  0x3c   : > { %p2330_p1 = por %p2329_p0, %p2328_p13 }
  0x3d   : > { %p2326_p12 = pneg %p2325_p10 }
  0x3e   : > { %p2332_p3 = por %p2331_p2, %p2330_p1 }
  0x40   : > { %p2333_p6 = pnand %p2332_p3, %p2326_p12 }
  0x42   : > { %2336 = shalt.err (!%p2333_p6)
}
  0x43   : > { %s2337_s27 = scalar_lea.vmem %s2521_s8, 16384  ;;  %s2401_s28 = smov [#allocation6]  }
  0x44   : > { %p2338_p7 = scmp.ne.s32.totalorder %s2521_s8, %s2337_s27  ;;  %s2341_s29 = sshll.u32 %s2401_s28, 4  ;;  %s2342_s29 = int_to_ptr.vmem [resolvable:$false] %s2341_s29 }
  0x45   : > { %s2343_s5 = scalar_lea.vmem %s2342_s29, 32768  ;;  %p2344_p10 = scmp.lt.s32.totalorder %s2521_s8, %s2342_s29 }
  0x46   : > { %p2339_p9 = pnand %p2338_p7, %p2460_p4  ;;  %p2345_p5 = scmp.lt.s32.totalorder %s2343_s5, %s2337_s27 }
  0x48   : > { %p2340_p8 = pneg %p2339_p9  ;;  %p2346_p13 = por %p2345_p5, %p2344_p10 }
  0x4a   : > { %p2347_p0 = pnand %p2346_p13, %p2340_p8 }
  0x4c   : > { %2350 = shalt.err (!%p2347_p0)
}
  0x4d   : > { %s2402_s6 = smov 256   ;;  %s2403_s7 = smov 128  }
  0x4e   : > { %s2404_s11 = smov 8  }
  0x4f   : > { %2255 = dma.hbm_to_vmem [thread:$0]  (%p2460_p4), %s2519_s19, 16384, %s2521_s8, %s196_s10, %s2402_s6, %s2403_s7, %s2404_s11  }
  0x50 PF: > { %217 = sbr.rel (%p2478_p11) target bundleno = 478 (0x1de), region = 32 }
  0x57   : > { %p3946_p12 = scmp.eq.s32.totalorder %s2445_s16, 0 }
  0x59   : > { %2368 = dma.done.wait (%p3946_p12), [#allocation4], 16   ;;  %p3947_p5 = pmov %p3946_p12 }
  0x5a   : > { %s2554_s18 = sand.u32 1, %s2385_s13   ;;  %p3948_p4 = scmp.ne.s32.totalorder %s3943_s22, 0 }
  0x5b   : > { %2370 = vsyncadd (%p3947_p5), [#allocation4], 4294967280  ;;  %s1999_s25 = sshll.u32 %s2554_s18, 10  ;;  %s224_s21 = scalar_lea.sflag [#allocation3], %s2554_s18 }
  0x5c   : > { %s2558_s30 = scalar_lea.vmem [#allocation5], %s1999_s25 }
  0x5d   : > { %2372 = dma.done.wait (%p3948_p4), %s224_s21, 16384  }
  0x5e   : > { %2374 = vsyncadd (%p3948_p4), %s224_s21, 4294950912  ;;  %s233_s24 = scalar_lea.sflag [#allocation7], %s2554_s18  ;;  %s2565_s8 = scalar_lea.vmem [#allocation6], %s1999_s25 }
  0x5f   : > { %2376 = dma.done.wait (%p3948_p4), %s233_s24, 16384  }
  0x60   : > { %2378 = vsyncadd (%p3948_p4), %s233_s24, 4294950912 }
  0x61   : > { %241 = sfence }
  0x62   : > { %s266_s19 = sld [smem:[#allocation2]]  ;;  %s2002_s10 = sld [smem:[#allocation2 + $0x1]]  ;;  %v991_v0 = vld [vmem:[%s2565_s8 + $0x80] sm:$0xff]  ;;  %v992_v10 = vld [vmem:[%s2565_s8 + $0x88] sm:$0xff]  ;;  %v993_v30 = vld [vmem:[%s2565_s8 + $0x90] sm:$0xff]  ;;  %vm731_vm0 = vcmask 1039360  }
  0x63   : > { %s2003_s15 = sld [smem:[#allocation2 + $0x2]]  ;;  %s2004_s4 = sld [smem:[#allocation2 + $0x3]]  ;;  %v2123_v1 = vld [vmem:[%s2565_s8 + $0x180] sm:$0xff]  ;;  %v2124_v11 = vld [vmem:[%s2565_s8 + $0x188] sm:$0xff]  ;;  %v2125_v35 = vld [vmem:[%s2565_s8 + $0x190] sm:$0xff] }
  0x64   : > { %v2155_v2 = vld [vmem:[%s2565_s8 + $0x280] sm:$0xff]  ;;  %v2156_v16 = vld [vmem:[%s2565_s8 + $0x288] sm:$0xff]  ;;  %v2157_v36 = vld [vmem:[%s2565_s8 + $0x290] sm:$0xff]  ;;  %s2850_s22 = sld [smem:[#allocation2 + $0x4]]  ;;  %s2405_s9 = smov 127  }
  0x65   : > { %v2187_v3 = vld [vmem:[%s2565_s8 + $0x380] sm:$0xff]  ;;  %v2188_v17 = vld [vmem:[%s2565_s8 + $0x388] sm:$0xff]  ;;  %v2189_v41 = vld [vmem:[%s2565_s8 + $0x390] sm:$0xff]  ;;  %s2006_s12 = sld [smem:[#allocation2 + $0x5]]  ;;  %s2007_s26 = sld [smem:[#allocation2 + $0x6]] }
  0x66   : > { %v975_v4 = vld [vmem:[%s2565_s8] sm:$0xff]  ;;  %v976_v22 = vld [vmem:[%s2565_s8 + $0x8] sm:$0xff]  ;;  %v977_v42 = vld [vmem:[%s2565_s8 + $0x10] sm:$0xff]  ;;  %s2001_s27 = sshll.u32 %s2554_s18, 9  ;;  %s2008_s29 = sld [smem:[#allocation2 + $0x7]] }
  0x67   : > { %v2107_v5 = vld [vmem:[%s2565_s8 + $0x100] sm:$0xff]  ;;  %v2108_v23 = vld [vmem:[%s2565_s8 + $0x108] sm:$0xff]  ;;  %v2109_v47 = vld [vmem:[%s2565_s8 + $0x110] sm:$0xff]  ;;  %s3386_s28 = scalar_lea.vmem [#allocation8], %s2001_s27  ;;  %s2009_s5 = sld [smem:[#allocation2 + $0x8]] }
  0x68   : > { %v2139_v6 = vld [vmem:[%s2565_s8 + $0x200] sm:$0xff]  ;;  %v2579_v8 = vstv %s266_s19  ;;  %v2581_v9 = vstv %s2002_s10  ;;  %v2140_v24 = vld [vmem:[%s2565_s8 + $0x208] sm:$0xff]  ;;  %s2010_s6 = sld [smem:[#allocation2 + $0x9]]  ;;  %p3983_p11 = scmp.ne.s32.totalorder %s3944_s23, 0 }
  0x69   : > { %v2171_v7 = vld [vmem:[%s2565_s8 + $0x300] sm:$0xff]  ;;  %v2585_v12 = vstv %s2003_s15  ;;  %v2587_v13 = vstv %s2004_s4  ;;  %v1023_v14 = vmul.f32 %v991_v0, %v2579_v8  ;;  %v1088_v15 = vmul.f32 %v2123_v1, %v2581_v9  ;;  %v2172_v29 = vld [vmem:[%s2565_s8 + $0x308] sm:$0xff]  ;;  %s2244_s7 = sshll.u32 (%p3983_p11), %s2445_s16, 8 }
  0x6a   : > { %v1185_v18 = vmul.f32 %v2155_v2, %v2585_v12  ;;  %v1282_v19 = vmul.f32 %v2187_v3, %v2587_v13  ;;  %v1007_v20 = vmul.f32 %v975_v4, %v2579_v8  ;;  %v1072_v21 = vmul.f32 %v2107_v5, %v2581_v9  ;;  %v2141_v48 = vld [vmem:[%s2565_s8 + $0x210] sm:$0xff]  ;;  %v994_v54 = vld [vmem:[%s2565_s8 + $0x98] sm:$0xff]  ;;  %s3779_s25 = scalar_lea.vmem (%p3983_p11), %s3922_s3, %s2244_s7 }
  0x6b   : > { %v1120_v25 = vadd.f32 %v1088_v15, %v1023_v14  ;;  %v1169_v26 = vmul.f32 %v2139_v6, %v2585_v12  ;;  %v1266_v27 = vmul.f32 %v2171_v7, %v2587_v13  ;;  %v1024_v28 = vmul.f32 %v992_v10, %v2579_v8  ;;  %v2173_v53 = vld [vmem:[%s2565_s8 + $0x310] sm:$0xff]  ;;  %v2126_v55 = vld [vmem:[%s2565_s8 + $0x198] sm:$0xff] }
  0x6c   : > { %v1104_v31 = vadd.f32 %v1072_v21, %v1007_v20  ;;  %v1089_v32 = vmul.f32 %v2124_v11, %v2581_v9  ;;  %v1186_v33 = vmul.f32 %v2156_v16, %v2585_v12  ;;  %v1283_v34 = vmul.f32 %v2188_v17, %v2587_v13  ;;  %v2158_v60 = vld [vmem:[%s2565_s8 + $0x298] sm:$0xff] }
  0x6d   : > { %v1217_v37 = vadd.f32 %v1185_v18, %v1120_v25  ;;  %v1008_v38 = vmul.f32 %v976_v22, %v2579_v8  ;;  %v1073_v39 = vmul.f32 %v2108_v23, %v2581_v9  ;;  %v1170_v40 = vmul.f32 %v2140_v24, %v2585_v12  ;;  %v2190_v1 = vld [vmem:[%s2565_s8 + $0x398] sm:$0xff]  ;;  %v995_v18 = vld [vmem:[%s2565_s8 + $0xa0] sm:$0xff] }
  0x6e   : > { %v1201_v43 = vadd.f32 %v1169_v26, %v1104_v31  ;;  %v1121_v44 = vadd.f32 %v1089_v32, %v1024_v28  ;;  %v1267_v45 = vmul.f32 %v2172_v29, %v2587_v13  ;;  %v1025_v46 = vmul.f32 %v993_v30, %v2579_v8  ;;  %v978_v2 = vld [vmem:[%s2565_s8 + $0x18] sm:$0xff]  ;;  %v2159_v24 = vld [vmem:[%s2565_s8 + $0x2a0] sm:$0xff] }
  0x6f   : > { %v1314_v49 = vadd.f32 %v1282_v19, %v1217_v37  ;;  %v1105_v50 = vadd.f32 %v1073_v39, %v1008_v38  ;;  %v1090_v51 = vmul.f32 %v2125_v35, %v2581_v9  ;;  %v1187_v52 = vmul.f32 %v2157_v36, %v2585_v12  ;;  %v2110_v3 = vld [vmem:[%s2565_s8 + $0x118] sm:$0xff]  ;;  %v2127_v19 = vld [vmem:[%s2565_s8 + $0x1a0] sm:$0xff]  ;;  %v996_v38 = vld [vmem:[%s2565_s8 + $0xa8] sm:$0xff] }
  0x70   : > { %v1298_v56 = vadd.f32 %v1266_v27, %v1201_v43  ;;  %v1218_v57 = vadd.f32 %v1186_v33, %v1121_v44  ;;  %v1284_v58 = vmul.f32 %v2189_v41, %v2587_v13  ;;  %v1009_v59 = vmul.f32 %v977_v42, %v2579_v8  ;;  %v2142_v10 = vld [vmem:[%s2565_s8 + $0x218] sm:$0xff]  ;;  %v2191_v25 = vld [vmem:[%s2565_s8 + $0x3a0] sm:$0xff]  ;;  %v2128_v39 = vld [vmem:[%s2565_s8 + $0x1a8] sm:$0xff] }
  0x71   : > { %1362 = vxpose.xlu1.b32.start [1/16] %v1314_v49, 128  ;;  %v1202_v61 = vadd.f32 %v1170_v40, %v1105_v50  ;;  %v1122_v62 = vadd.f32 %v1090_v51, %v1025_v46  ;;  %v1074_v63 = vmul.f32 %v2109_v47, %v2581_v9  ;;  %v1171_v0 = vmul.f32 %v2141_v48, %v2585_v12  ;;  %v2174_v11 = vld [vmem:[%s2565_s8 + $0x318] sm:$0xff]  ;;  %v979_v26 = vld [vmem:[%s2565_s8 + $0x20] sm:$0xff]  ;;  %v2160_v44 = vld [vmem:[%s2565_s8 + $0x2a8] sm:$0xff] }
  0x72   : > { %1330 = vxpose.xlu0.b32.start [1/16] %v1298_v56, 128  ;;  %v1315_v4 = vadd.f32 %v1283_v34, %v1218_v57  ;;  %v1268_v5 = vmul.f32 %v2173_v53, %v2587_v13  ;;  %v1026_v6 = vmul.f32 %v994_v54, %v2579_v8  ;;  %v1091_v7 = vmul.f32 %v2126_v55, %v2581_v9  ;;  %v2111_v31 = vld [vmem:[%s2565_s8 + $0x120] sm:$0xff]  ;;  %v980_v49 = vld [vmem:[%s2565_s8 + $0x28] sm:$0xff] }
  0x73   : > { %v1299_v14 = vadd.f32 %v1267_v45, %v1202_v61  ;;  %v1219_v15 = vadd.f32 %v1187_v52, %v1122_v62  ;;  %v1106_v16 = vadd.f32 %v1074_v63, %v1009_v59  ;;  %v1188_v17 = vmul.f32 %v2158_v60, %v2585_v12  ;;  %v2143_v32 = vld [vmem:[%s2565_s8 + $0x220] sm:$0xff]  ;;  %v2112_v50 = vld [vmem:[%s2565_s8 + $0x128] sm:$0xff]  ;;  %v997_v61 = vld [vmem:[%s2565_s8 + $0xb0] sm:$0xff] }
  0x74   : > { %v1123_v20 = vadd.f32 %v1091_v7, %v1026_v6  ;;  %v1285_v21 = vmul.f32 %v2190_v1, %v2587_v13  ;;  %v1010_v22 = vmul.f32 %v978_v2, %v2579_v8  ;;  %v1075_v23 = vmul.f32 %v2110_v3, %v2581_v9  ;;  %v2175_v37 = vld [vmem:[%s2565_s8 + $0x320] sm:$0xff]  ;;  %v2192_v55 = vld [vmem:[%s2565_s8 + $0x3a8] sm:$0xff]  ;;  %v2129_v62 = vld [vmem:[%s2565_s8 + $0x1b0] sm:$0xff] }
  0x75   : > { %1363 = vxpose.xlu1.b32.cont [2/16] %v1315_v4, 128  ;;  %v1316_v27 = vadd.f32 %v1284_v58, %v1219_v15  ;;  %v1203_v28 = vadd.f32 %v1171_v0, %v1106_v16  ;;  %v1172_v29 = vmul.f32 %v2142_v10, %v2585_v12  ;;  %v1269_v30 = vmul.f32 %v2174_v11, %v2587_v13  ;;  %v2144_v56 = vld [vmem:[%s2565_s8 + $0x228] sm:$0xff]  ;;  %v2161_v3 = vld [vmem:[%s2565_s8 + $0x2b0] sm:$0xff] }
  0x76   : > { %1331 = vxpose.xlu0.b32.cont [2/16] %v1299_v14, 128  ;;  %v1220_v33 = vadd.f32 %v1188_v17, %v1123_v20  ;;  %v1107_v34 = vadd.f32 %v1075_v23, %v1010_v22  ;;  %v1027_v35 = vmul.f32 %v995_v18, %v2579_v8  ;;  %v1092_v36 = vmul.f32 %v2127_v19, %v2581_v9  ;;  %v2176_v2 = vld [vmem:[%s2565_s8 + $0x328] sm:$0xff]  ;;  %v981_v4 = vld [vmem:[%s2565_s8 + $0x30] sm:$0xff]  ;;  %v998_v20 = vld [vmem:[%s2565_s8 + $0xb8] sm:$0xff] }
  0x77   : > { %v1300_v40 = vadd.f32 %v1268_v5, %v1203_v28  ;;  %v1189_v41 = vmul.f32 %v2159_v24, %v2585_v12  ;;  %v1286_v42 = vmul.f32 %v2191_v25, %v2587_v13  ;;  %v1011_v43 = vmul.f32 %v979_v26, %v2579_v8  ;;  %v2193_v11 = vld [vmem:[%s2565_s8 + $0x3b0] sm:$0xff] }
  0x78   : > { %v1317_v45 = vadd.f32 %v1285_v21, %v1220_v33  ;;  %v1204_v46 = vadd.f32 %v1172_v29, %v1107_v34  ;;  %v1124_v47 = vadd.f32 %v1092_v36, %v1027_v35  ;;  %v1076_v48 = vmul.f32 %v2111_v31, %v2581_v9  ;;  %v2113_v14 = vld [vmem:[%s2565_s8 + $0x130] sm:$0xff]  ;;  %v2130_v21 = vld [vmem:[%s2565_s8 + $0x1b8] sm:$0xff] }
  0x79   : > { %1364 = vxpose.xlu1.b32.cont [3/16] %v1316_v27, 128  ;;  %v1173_v51 = vmul.f32 %v2143_v32, %v2585_v12  ;;  %v1270_v52 = vmul.f32 %v2175_v37, %v2587_v13  ;;  %v1028_v53 = vmul.f32 %v996_v38, %v2579_v8  ;;  %v1093_v54 = vmul.f32 %v2128_v39, %v2581_v9  ;;  %v2145_v19 = vld [vmem:[%s2565_s8 + $0x230] sm:$0xff]  ;;  %v2162_v27 = vld [vmem:[%s2565_s8 + $0x2b8] sm:$0xff] }
  0x7a   : > { %1332 = vxpose.xlu0.b32.cont [3/16] %v1300_v40, 128  ;;  %v1301_v57 = vadd.f32 %v1269_v30, %v1204_v46  ;;  %v1221_v58 = vadd.f32 %v1189_v41, %v1124_v47  ;;  %v1108_v59 = vadd.f32 %v1076_v48, %v1011_v43  ;;  %v1190_v60 = vmul.f32 %v2160_v44, %v2585_v12  ;;  %v2177_v26 = vld [vmem:[%s2565_s8 + $0x330] sm:$0xff]  ;;  %v982_v32 = vld [vmem:[%s2565_s8 + $0x38] sm:$0xff]  ;;  %v999_v44 = vld [vmem:[%s2565_s8 + $0xc0] sm:$0xff] }
  0x7b   : > { %v1125_v63 = vadd.f32 %v1093_v54, %v1028_v53  ;;  %v1012_v0 = vmul.f32 %v980_v49, %v2579_v8  ;;  %v1077_v1 = vmul.f32 %v2112_v50, %v2581_v9  ;;  %v1287_v7 = vmul.f32 %v2192_v55, %v2587_v13  ;;  %v2114_v33 = vld [vmem:[%s2565_s8 + $0x138] sm:$0xff] }
  0x7c   : > { %v1318_v5 = vadd.f32 %v1286_v42, %v1221_v58  ;;  %v1205_v6 = vadd.f32 %v1173_v51, %v1108_v59  ;;  %v1174_v10 = vmul.f32 %v2144_v56, %v2585_v12  ;;  %v1029_v17 = vmul.f32 %v997_v61, %v2579_v8  ;;  %v2194_v38 = vld [vmem:[%s2565_s8 + $0x3b8] sm:$0xff]  ;;  %v2163_v51 = vld [vmem:[%s2565_s8 + $0x2c0] sm:$0xff] }
  0x7d   : > { %1365 = vxpose.xlu1.b32.cont [4/16] %v1317_v45, 128  ;;  %v1222_v15 = vadd.f32 %v1190_v60, %v1125_v63  ;;  %v1109_v16 = vadd.f32 %v1077_v1, %v1012_v0  ;;  %v1094_v18 = vmul.f32 %v2129_v62, %v2581_v9  ;;  %v1271_v23 = vmul.f32 %v2176_v2, %v2587_v13  ;;  %v2146_v39 = vld [vmem:[%s2565_s8 + $0x238] sm:$0xff]  ;;  %v2131_v45 = vld [vmem:[%s2565_s8 + $0x1c0] sm:$0xff]  ;;  %v1000_v62 = vld [vmem:[%s2565_s8 + $0xc8] sm:$0xff] }
  0x7e   : > { %1333 = vxpose.xlu0.b32.cont [4/16] %v1301_v57, 128  ;;  %v1302_v22 = vadd.f32 %v1270_v52, %v1205_v6  ;;  %v1191_v24 = vmul.f32 %v2161_v3, %v2585_v12  ;;  %v1013_v25 = vmul.f32 %v981_v4, %v2579_v8  ;;  %v1288_v30 = vmul.f32 %v2193_v11, %v2587_v13  ;;  %v2178_v50 = vld [vmem:[%s2565_s8 + $0x338] sm:$0xff]  ;;  %v983_v52 = vld [vmem:[%s2565_s8 + $0x40] sm:$0xff]  ;;  %v2132_v63 = vld [vmem:[%s2565_s8 + $0x1c8] sm:$0xff] }
  0x7f   : > { %v1206_v28 = vadd.f32 %v1174_v10, %v1109_v16  ;;  %v1126_v29 = vadd.f32 %v1094_v18, %v1029_v17  ;;  %v1078_v31 = vmul.f32 %v2113_v14, %v2581_v9  ;;  %v1319_v34 = vadd.f32 %v1287_v7, %v1222_v15  ;;  %v2115_v56 = vld [vmem:[%s2565_s8 + $0x140] sm:$0xff]  ;;  %v2164_v11 = vld [vmem:[%s2565_s8 + $0x2c8] sm:$0xff] }
  0x80   : > { %v1175_v35 = vmul.f32 %v2145_v19, %v2585_v12  ;;  %v1030_v36 = vmul.f32 %v998_v20, %v2579_v8  ;;  %v1095_v37 = vmul.f32 %v2130_v21, %v2581_v9  ;;  %v1272_v42 = vmul.f32 %v2177_v26, %v2587_v13  ;;  %v2147_v61 = vld [vmem:[%s2565_s8 + $0x240] sm:$0xff]  ;;  %v984_v14 = vld [vmem:[%s2565_s8 + $0x48] sm:$0xff]  ;;  %v1001_v26 = vld [vmem:[%s2565_s8 + $0xd0] sm:$0xff] }
  0x81   : > { %1366 = vxpose.xlu1.b32.cont [5/16] %v1318_v5, 128  ;;  %v1223_v40 = vadd.f32 %v1191_v24, %v1126_v29  ;;  %v1110_v41 = vadd.f32 %v1078_v31, %v1013_v25  ;;  %v1192_v43 = vmul.f32 %v2162_v27, %v2585_v12  ;;  %v1303_v46 = vadd.f32 %v1271_v23, %v1206_v28  ;;  %v2195_v3 = vld [vmem:[%s2565_s8 + $0x3c0] sm:$0xff]  ;;  %v2116_v15 = vld [vmem:[%s2565_s8 + $0x148] sm:$0xff]  ;;  %v2133_v27 = vld [vmem:[%s2565_s8 + $0x1d0] sm:$0xff] }
  0x82   : > { %1334 = vxpose.xlu0.b32.cont [5/16] %v1302_v22, 128  ;;  %v1127_v47 = vadd.f32 %v1095_v37, %v1030_v36  ;;  %v1014_v48 = vmul.f32 %v982_v32, %v2579_v8  ;;  %v1079_v49 = vmul.f32 %v2114_v33, %v2581_v9  ;;  %v1289_v54 = vmul.f32 %v2194_v38, %v2587_v13  ;;  %v2179_v17 = vld [vmem:[%s2565_s8 + $0x340] sm:$0xff]  ;;  %v2148_v20 = vld [vmem:[%s2565_s8 + $0x248] sm:$0xff]  ;;  %v2165_v33 = vld [vmem:[%s2565_s8 + $0x2d0] sm:$0xff] }
  0x83   : > { %v1207_v53 = vadd.f32 %v1175_v35, %v1110_v41  ;;  %v1176_v55 = vmul.f32 %v2146_v39, %v2585_v12  ;;  %v1031_v59 = vmul.f32 %v999_v44, %v2579_v8  ;;  %v1096_v60 = vmul.f32 %v2131_v45, %v2581_v9  ;;  %v2196_v25 = vld [vmem:[%s2565_s8 + $0x3c8] sm:$0xff]  ;;  %v2117_v39 = vld [vmem:[%s2565_s8 + $0x150] sm:$0xff]  ;;  %v1002_v45 = vld [vmem:[%s2565_s8 + $0xd8] sm:$0xff] }
  0x84   : > { %v1224_v57 = vadd.f32 %v1192_v43, %v1127_v47  ;;  %v1111_v58 = vadd.f32 %v1079_v49, %v1014_v48  ;;  %v1320_v0 = vadd.f32 %v1288_v30, %v1223_v40  ;;  %v1273_v1 = vmul.f32 %v2178_v50, %v2587_v13  ;;  %v2180_v32 = vld [vmem:[%s2565_s8 + $0x348] sm:$0xff]  ;;  %v2149_v44 = vld [vmem:[%s2565_s8 + $0x250] sm:$0xff] }
  0x85   : > { %1367 = vxpose.xlu1.b32.cont [6/16] %v1319_v34, 128  ;;  %v1193_v2 = vmul.f32 %v2163_v51, %v2585_v12  ;;  %v1015_v4 = vmul.f32 %v983_v52, %v2579_v8  ;;  %v1304_v5 = vadd.f32 %v1272_v42, %v1207_v53  ;;  %v1128_v7 = vadd.f32 %v1096_v60, %v1031_v59  ;;  %v985_v34 = vld [vmem:[%s2565_s8 + $0x50] sm:$0xff]  ;;  %v2166_v52 = vld [vmem:[%s2565_s8 + $0x2d8] sm:$0xff] }
  0x86   : > { %1335 = vxpose.xlu0.b32.cont [6/16] %v1303_v46, 128  ;;  %v1208_v6 = vadd.f32 %v1176_v55, %v1111_v58  ;;  %v1080_v10 = vmul.f32 %v2115_v56, %v2581_v9  ;;  %v1177_v16 = vmul.f32 %v2147_v61, %v2585_v12  ;;  %v1032_v18 = vmul.f32 %v1000_v62, %v2579_v8  ;;  %v2134_v46 = vld [vmem:[%s2565_s8 + $0x1d8] sm:$0xff]  ;;  %v2197_v50 = vld [vmem:[%s2565_s8 + $0x3d0] sm:$0xff] }
  0x87   : > { %v1097_v19 = vmul.f32 %v2132_v63, %v2581_v9  ;;  %v1321_v21 = vadd.f32 %v1289_v54, %v1224_v57  ;;  %v1225_v22 = vadd.f32 %v1193_v2, %v1128_v7  ;;  %v1290_v23 = vmul.f32 %v2195_v3, %v2587_v13  ;;  %v986_v57 = vld [vmem:[%s2565_s8 + $0x58] sm:$0xff]  ;;  %v2181_v61 = vld [vmem:[%s2565_s8 + $0x350] sm:$0xff] }
  0x88   : > { %v1112_v24 = vadd.f32 %v1080_v10, %v1015_v4  ;;  %v1194_v29 = vmul.f32 %v2164_v11, %v2585_v12  ;;  %v1016_v30 = vmul.f32 %v984_v14, %v2579_v8  ;;  %v1081_v31 = vmul.f32 %v2116_v15, %v2581_v9  ;;  %v2118_v58 = vld [vmem:[%s2565_s8 + $0x158] sm:$0xff]  ;;  %v1003_v4 = vld [vmem:[%s2565_s8 + $0xe0] sm:$0xff] }
  0x89   : > { %1368 = vxpose.xlu1.b32.cont [7/16] %v1320_v0, 128  ;;  %v1129_v28 = vadd.f32 %v1097_v19, %v1032_v18  ;;  %v1305_v35 = vadd.f32 %v1273_v1, %v1208_v6  ;;  %v1274_v37 = vmul.f32 %v2179_v17, %v2587_v13  ;;  %v1178_v38 = vmul.f32 %v2148_v20, %v2585_v12  ;;  %v2150_v3 = vld [vmem:[%s2565_s8 + $0x258] sm:$0xff]  ;;  %v2167_v15 = vld [vmem:[%s2565_s8 + $0x2e0] sm:$0xff] }
  0x8a   : > { %1336 = vxpose.xlu0.b32.cont [7/16] %v1304_v5, 128  ;;  %v1209_v36 = vadd.f32 %v1177_v16, %v1112_v24  ;;  %v1291_v40 = vmul.f32 %v2196_v25, %v2587_v13  ;;  %v1113_v41 = vadd.f32 %v1081_v31, %v1016_v30  ;;  %v1033_v42 = vmul.f32 %v1001_v26, %v2579_v8  ;;  %v2135_v5 = vld [vmem:[%s2565_s8 + $0x1e0] sm:$0xff]  ;;  %v2198_v10 = vld [vmem:[%s2565_s8 + $0x3d8] sm:$0xff] }
  0x8b   : > { %v1098_v43 = vmul.f32 %v2133_v27, %v2581_v9  ;;  %v1322_v47 = vadd.f32 %v1290_v23, %v1225_v22  ;;  %v1275_v48 = vmul.f32 %v2180_v32, %v2587_v13  ;;  %v1195_v49 = vmul.f32 %v2165_v33, %v2585_v12  ;;  %v987_v16 = vld [vmem:[%s2565_s8 + $0x60] sm:$0xff] }
  0x8c   : > { %v1017_v51 = vmul.f32 %v985_v34, %v2579_v8  ;;  %v1226_v53 = vadd.f32 %v1194_v29, %v1129_v28  ;;  %v1210_v54 = vadd.f32 %v1178_v38, %v1113_v41  ;;  %v1082_v56 = vmul.f32 %v2117_v39, %v2581_v9  ;;  %v2119_v22 = vld [vmem:[%s2565_s8 + $0x160] sm:$0xff]  ;;  %v1004_v28 = vld [vmem:[%s2565_s8 + $0xe8] sm:$0xff] }
  0x8d   : > { %1369 = vxpose.xlu1.b32.cont [8/16] %v1321_v21, 128  ;;  %v1130_v55 = vadd.f32 %v1098_v43, %v1033_v42  ;;  %v1306_v59 = vadd.f32 %v1274_v37, %v1209_v36  ;;  %v1179_v60 = vmul.f32 %v2149_v44, %v2585_v12  ;;  %v1034_v62 = vmul.f32 %v1002_v45, %v2579_v8  ;;  %v2182_v21 = vld [vmem:[%s2565_s8 + $0x358] sm:$0xff]  ;;  %v2151_v27 = vld [vmem:[%s2565_s8 + $0x260] sm:$0xff]  ;;  %v2136_v29 = vld [vmem:[%s2565_s8 + $0x1e8] sm:$0xff] }
  0x8e   : > { %1337 = vxpose.xlu0.b32.cont [8/16] %v1305_v35, 128  ;;  %v1099_v63 = vmul.f32 %v2134_v46, %v2581_v9  ;;  %v1292_v0 = vmul.f32 %v2197_v50, %v2587_v13  ;;  %v1114_v1 = vadd.f32 %v1082_v56, %v1017_v51  ;;  %v1196_v2 = vmul.f32 %v2166_v52, %v2585_v12  ;;  %v2199_v33 = vld [vmem:[%s2565_s8 + $0x3e0] sm:$0xff]  ;;  %v988_v38 = vld [vmem:[%s2565_s8 + $0x68] sm:$0xff]  ;;  %v1005_v51 = vld [vmem:[%s2565_s8 + $0xf0] sm:$0xff] }
  0x8f   : > { %v1227_v6 = vadd.f32 %v1195_v49, %v1130_v55  ;;  %v1018_v11 = vmul.f32 %v986_v57, %v2579_v8  ;;  %v1083_v14 = vmul.f32 %v2118_v58, %v2581_v9  ;;  %v1323_v17 = vadd.f32 %v1291_v40, %v1226_v53  ;;  %v2120_v39 = vld [vmem:[%s2565_s8 + $0x168] sm:$0xff]  ;;  %v2183_v42 = vld [vmem:[%s2565_s8 + $0x360] sm:$0xff]  ;;  %v2137_v52 = vld [vmem:[%s2565_s8 + $0x1f0] sm:$0xff] }
  0x90   : > { %v1131_v7 = vadd.f32 %v1099_v63, %v1034_v62  ;;  %v1307_v18 = vadd.f32 %v1275_v48, %v1210_v54  ;;  %v1211_v19 = vadd.f32 %v1179_v60, %v1114_v1  ;;  %v1276_v20 = vmul.f32 %v2181_v61, %v2587_v13  ;;  %v2168_v45 = vld [vmem:[%s2565_s8 + $0x2e8] sm:$0xff]  ;;  %v989_v57 = vld [vmem:[%s2565_s8 + $0x70] sm:$0xff] }
  0x91   : > { %1370 = vxpose.xlu1.b32.cont [9/16] %v1322_v47, 128  ;;  %v1115_v23 = vadd.f32 %v1083_v14, %v1018_v11  ;;  %v1180_v24 = vmul.f32 %v2150_v3, %v2585_v12  ;;  %v1035_v25 = vmul.f32 %v1003_v4, %v2579_v8  ;;  %v1100_v26 = vmul.f32 %v2135_v5, %v2581_v9  ;;  %v2152_v50 = vld [vmem:[%s2565_s8 + $0x268] sm:$0xff]  ;;  %v2121_v63 = vld [vmem:[%s2565_s8 + $0x170] sm:$0xff]  ;;  %v2138_v11 = vld [vmem:[%s2565_s8 + $0x1f8] sm:$0xff] }
  0x92   : > { %1338 = vxpose.xlu0.b32.cont [9/16] %v1306_v59, 128  ;;  %v1228_v30 = vadd.f32 %v1196_v2, %v1131_v7  ;;  %v1293_v31 = vmul.f32 %v2198_v10, %v2587_v13  ;;  %v1197_v32 = vmul.f32 %v2167_v15, %v2585_v12  ;;  %v1019_v34 = vmul.f32 %v987_v16, %v2579_v8  ;;  %v2200_v62 = vld [vmem:[%s2565_s8 + $0x3e8] sm:$0xff]  ;;  %v2169_v5 = vld [vmem:[%s2565_s8 + $0x2f0] sm:$0xff]  ;;  %v1006_v10 = vld [vmem:[%s2565_s8 + $0xf8] sm:$0xff] }
  0x93   : > { %v1324_v35 = vadd.f32 %v1292_v0, %v1227_v6  ;;  %v1132_v36 = vadd.f32 %v1100_v26, %v1035_v25  ;;  %v1084_v37 = vmul.f32 %v2119_v22, %v2581_v9  ;;  %v1277_v40 = vmul.f32 %v2182_v21, %v2587_v13  ;;  %v2184_v2 = vld [vmem:[%s2565_s8 + $0x368] sm:$0xff]  ;;  %v2201_v26 = vld [vmem:[%s2565_s8 + $0x3f0] sm:$0xff] }
  0x94   : > { %v1181_v41 = vmul.f32 %v2151_v27, %v2585_v12  ;;  %v1036_v43 = vmul.f32 %v1004_v28, %v2579_v8  ;;  %v1101_v44 = vmul.f32 %v2136_v29, %v2581_v9  ;;  %v1308_v46 = vadd.f32 %v1276_v20, %v1211_v19  ;;  %v2122_v19 = vld [vmem:[%s2565_s8 + $0x178] sm:$0xff] }
  0x95   : > { %1371 = vxpose.xlu1.b32.cont [10/16] %v1323_v17, 128  ;;  %v1212_v47 = vadd.f32 %v1180_v24, %v1115_v23  ;;  %v1294_v48 = vmul.f32 %v2199_v33, %v2587_v13  ;;  %v1116_v49 = vadd.f32 %v1084_v37, %v1019_v34  ;;  %v1325_v53 = vadd.f32 %v1293_v31, %v1228_v30  ;;  %v2153_v17 = vld [vmem:[%s2565_s8 + $0x270] sm:$0xff] }
  0x96   : > { %1339 = vxpose.xlu0.b32.cont [10/16] %v1307_v18, 128  ;;  %v1229_v54 = vadd.f32 %v1197_v32, %v1132_v36  ;;  %v1020_v55 = vmul.f32 %v988_v38, %v2579_v8  ;;  %v1085_v56 = vmul.f32 %v2120_v39, %v2581_v9  ;;  %v1278_v59 = vmul.f32 %v2183_v42, %v2587_v13  ;;  %v990_v18 = vld [vmem:[%s2565_s8 + $0x78] sm:$0xff]  ;;  %v2185_v31 = vld [vmem:[%s2565_s8 + $0x370] sm:$0xff] }
  0x97   : > { %v1213_v58 = vadd.f32 %v1181_v41, %v1116_v49  ;;  %v1133_v60 = vadd.f32 %v1101_v44, %v1036_v43  ;;  %v1198_v61 = vmul.f32 %v2168_v45, %v2585_v12  ;;  %v1182_v1 = vmul.f32 %v2152_v50, %v2585_v12  ;;  %v2170_v32 = vld [vmem:[%s2565_s8 + $0x2f8] sm:$0xff] }
  0x98   : > { %v1117_v0 = vadd.f32 %v1085_v56, %v1020_v55  ;;  %v1037_v3 = vmul.f32 %v1005_v51, %v2579_v8  ;;  %v1102_v4 = vmul.f32 %v2137_v52, %v2581_v9  ;;  %v1309_v6 = vadd.f32 %v1277_v40, %v1212_v47  ;;  %v2202_v44 = vld [vmem:[%s2565_s8 + $0x3f8] sm:$0xff]  ;;  %v278_v56 = vld [vmem:[%s2558_s30 + $0x10] sm:$0xff] }
  0x99   : > { %1372 = vxpose.xlu1.b32.cont [11/16] %v1324_v35, 128  ;;  %v1021_v7 = vmul.f32 %v989_v57, %v2579_v8  ;;  %v1326_v14 = vadd.f32 %v1294_v48, %v1229_v54  ;;  %v1295_v15 = vmul.f32 %v2200_v62, %v2587_v13  ;;  %v1086_v16 = vmul.f32 %v2121_v63, %v2581_v9  ;;  %v2154_v35 = vld [vmem:[%s2565_s8 + $0x278] sm:$0xff]  ;;  %v2013_v57 = vld [vmem:[%s2558_s30 + $0x110] sm:$0xff] }
  0x9a   : > { %1340 = vxpose.xlu0.b32.cont [11/16] %v1308_v46, 128  ;;  %v1310_v20 = vadd.f32 %v1278_v59, %v1213_v58  ;;  %v1230_v21 = vadd.f32 %v1198_v61, %v1133_v60  ;;  %v1279_v22 = vmul.f32 %v2184_v2, %v2587_v13  ;;  %v1199_v23 = vmul.f32 %v2169_v5, %v2585_v12  ;;  %v2186_v47 = vld [vmem:[%s2565_s8 + $0x378] sm:$0xff]  ;;  %v281_v60 = vld [vmem:[%s2558_s30 + $0x28] sm:$0xff]  ;;  %v2011_v2 = vld [vmem:[%s2558_s30 + $0x100] sm:$0xff] }
  0x9b   : > { %v1214_v24 = vadd.f32 %v1182_v1, %v1117_v0  ;;  %v1134_v25 = vadd.f32 %v1102_v4, %v1037_v3  ;;  %v1038_v27 = vmul.f32 %v1006_v10, %v2579_v8  ;;  %v1103_v28 = vmul.f32 %v2138_v11, %v2581_v9  ;;  %v279_v58 = vld [vmem:[%s2558_s30 + $0x18] sm:$0xff]  ;;  %v2016_v61 = vld [vmem:[%s2558_s30 + $0x128] sm:$0xff]  ;;  %v2045_v0 = vld [vmem:[%s2558_s30 + $0x210] sm:$0xff] }
  0x9c   : > { %v1118_v29 = vadd.f32 %v1086_v16, %v1021_v7  ;;  %v1183_v30 = vmul.f32 %v2153_v17, %v2585_v12  ;;  %v1022_v33 = vmul.f32 %v990_v18, %v2579_v8  ;;  %v1087_v34 = vmul.f32 %v2122_v19, %v2581_v9  ;;  %v2014_v59 = vld [vmem:[%s2558_s30 + $0x118] sm:$0xff]  ;;  %v276_v1 = vld [vmem:[%s2558_s30] sm:$0xff]  ;;  %v2048_v10 = vld [vmem:[%s2558_s30 + $0x228] sm:$0xff] }
  0x9d   : > { %1373 = vxpose.xlu1.b32.cont [12/16] %v1325_v53, 128  ;;  %v1327_v36 = vadd.f32 %v1295_v15, %v1230_v21  ;;  %v1296_v37 = vmul.f32 %v2201_v26, %v2587_v13  ;;  %v1231_v38 = vadd.f32 %v1199_v23, %v1134_v25  ;;  %v1280_v39 = vmul.f32 %v2185_v31, %v2587_v13  ;;  %v2046_v7 = vld [vmem:[%s2558_s30 + $0x218] sm:$0xff]  ;;  %v2077_v15 = vld [vmem:[%s2558_s30 + $0x310] sm:$0xff]  ;;  %v2080_v19 = vld [vmem:[%s2558_s30 + $0x328] sm:$0xff] }
  0x9e   : > { %1341 = vxpose.xlu0.b32.cont [12/16] %v1309_v6, 128  ;;  %v1135_v40 = vadd.f32 %v1103_v28, %v1038_v27  ;;  %v1200_v41 = vmul.f32 %v2170_v32, %v2585_v12  ;;  %v1311_v42 = vadd.f32 %v1279_v22, %v1214_v24  ;;  %v1215_v43 = vadd.f32 %v1183_v30, %v1118_v29  ;;  %v2078_v16 = vld [vmem:[%s2558_s30 + $0x318] sm:$0xff]  ;;  %v277_v27 = vld [vmem:[%s2558_s30 + $0x8] sm:$0xff] }
  0x9f   : > { %v1119_v45 = vadd.f32 %v1087_v34, %v1022_v33  ;;  %v1184_v46 = vmul.f32 %v2154_v35, %v2585_v12  ;;  %v1328_v48 = vadd.f32 %v1296_v37, %v1231_v38  ;;  %v1297_v50 = vmul.f32 %v2202_v44, %v2587_v13  ;;  %v283_v21 = vld [vmem:[%s2558_s30 + $0x38] sm:$0xff]  ;;  %v2012_v28 = vld [vmem:[%s2558_s30 + $0x108] sm:$0xff]  ;;  %v280_v37 = vld [vmem:[%s2558_s30 + $0x20] sm:$0xff] }
  0xa0   : > { %v1232_v49 = vadd.f32 %v1200_v41, %v1135_v40  ;;  %v1312_v51 = vadd.f32 %v1280_v39, %v1215_v43  ;;  %v1281_v53 = vmul.f32 %v2186_v47, %v2587_v13  ;;  %v311_v62 = vmul.f32 %v2579_v8, %v278_v56  ;;  %v2018_v26 = vld [vmem:[%s2558_s30 + $0x138] sm:$0xff]  ;;  %v285_v31 = vld [vmem:[%s2558_s30 + $0x48] sm:$0xff]  ;;  %v2015_v38 = vld [vmem:[%s2558_s30 + $0x120] sm:$0xff] }
  0xa1   : > { %1374 = vxpose.xlu1.b32.cont [13/16] %v1326_v14, 128  ;;  %v1216_v52 = vadd.f32 %v1184_v46, %v1119_v45  ;;  %v377_v63 = vmul.f32 %v2013_v57, %v2581_v9  ;;  %v312_v3 = vmul.f32 %v2579_v8, %v279_v58  ;;  %v378_v4 = vmul.f32 %v2014_v59, %v2581_v9  ;;  %v2020_v32 = vld [vmem:[%s2558_s30 + $0x148] sm:$0xff]  ;;  %v2075_v39 = vld [vmem:[%s2558_s30 + $0x300] sm:$0xff]  ;;  %v2082_v47 = vld [vmem:[%s2558_s30 + $0x338] sm:$0xff] }
  0xa2   : > { %1342 = vxpose.xlu0.b32.cont [13/16] %v1310_v20, 128  ;;  %v1329_v54 = vadd.f32 %v1297_v50, %v1232_v49  ;;  %v314_v5 = vmul.f32 %v2579_v8, %v281_v60  ;;  %v380_v6 = vmul.f32 %v2016_v61, %v2581_v9  ;;  %v475_v14 = vmul.f32 %v2045_v0, %v2585_v12  ;;  %v2043_v20 = vld [vmem:[%s2558_s30 + $0x200] sm:$0xff]  ;;  %v287_v60 = vld [vmem:[%s2558_s30 + $0x58] sm:$0xff] }
  0xa3   : > { %v1313_v55 = vadd.f32 %v1281_v53, %v1216_v52  ;;  %v409_v11 = vadd.f32 %v377_v63, %v311_v62  ;;  %v309_v17 = vmul.f32 %v2579_v8, %v276_v1  ;;  %v375_v18 = vmul.f32 %v2011_v2, %v2581_v9  ;;  %v2052_v52 = vld [vmem:[%s2558_s30 + $0x248] sm:$0xff]  ;;  %v2047_v59 = vld [vmem:[%s2558_s30 + $0x220] sm:$0xff]  ;;  %v2022_v61 = vld [vmem:[%s2558_s30 + $0x158] sm:$0xff] }
  0xa4   : > { %v410_v22 = vadd.f32 %v378_v4, %v312_v3  ;;  %v476_v23 = vmul.f32 %v2046_v7, %v2585_v12  ;;  %v412_v24 = vadd.f32 %v380_v6, %v314_v5  ;;  %v478_v25 = vmul.f32 %v2048_v10, %v2585_v12  ;;  %v2076_v2 = vld [vmem:[%s2558_s30 + $0x308] sm:$0xff]  ;;  %v282_v3 = vld [vmem:[%s2558_s30 + $0x30] sm:$0xff] }
  0xa5   : > { %1375 = vxpose.xlu1.b32.cont [14/16] %v1327_v36, 128  ;;  %v573_v29 = vmul.f32 %v2077_v15, %v2587_v13  ;;  %v574_v30 = vmul.f32 %v2078_v16, %v2587_v13  ;;  %v507_v33 = vadd.f32 %v475_v14, %v409_v11  ;;  %v576_v34 = vmul.f32 %v2080_v19, %v2587_v13  ;;  %v2017_v4 = vld [vmem:[%s2558_s30 + $0x130] sm:$0xff]  ;;  %v2084_v11 = vld [vmem:[%s2558_s30 + $0x348] sm:$0xff] }
  0xa6   : > { %1343 = vxpose.xlu0.b32.cont [14/16] %v1311_v42, 128  ;;  %v407_v35 = vadd.f32 %v375_v18, %v309_v17  ;;  %v473_v36 = vmul.f32 %v2043_v20, %v2585_v12  ;;  %v316_v40 = vmul.f32 %v2579_v8, %v283_v21  ;;  %v382_v41 = vmul.f32 %v2018_v26, %v2581_v9  ;;  %v2050_v42 = vld [vmem:[%s2558_s30 + $0x238] sm:$0xff]  ;;  %v289_v14 = vld [vmem:[%s2558_s30 + $0x68] sm:$0xff]  ;;  %v2079_v18 = vld [vmem:[%s2558_s30 + $0x320] sm:$0xff] }
  0xa7   : > { %v310_v43 = vmul.f32 %v2579_v8, %v277_v27  ;;  %v376_v44 = vmul.f32 %v2012_v28, %v2581_v9  ;;  %v508_v45 = vadd.f32 %v476_v23, %v410_v22  ;;  %v510_v46 = vadd.f32 %v478_v25, %v412_v24  ;;  %v2024_v15 = vld [vmem:[%s2558_s30 + $0x168] sm:$0xff]  ;;  %v284_v21 = vld [vmem:[%s2558_s30 + $0x40] sm:$0xff]  ;;  %v2054_v25 = vld [vmem:[%s2558_s30 + $0x258] sm:$0xff] }
  0xa8   : > { %v318_v49 = vmul.f32 %v2579_v8, %v285_v31  ;;  %v384_v50 = vmul.f32 %v2020_v32, %v2581_v9  ;;  %v313_v53 = vmul.f32 %v2579_v8, %v280_v37  ;;  %v505_v56 = vadd.f32 %v473_v36, %v407_v35  ;;  %v2019_v22 = vld [vmem:[%s2558_s30 + $0x140] sm:$0xff]  ;;  %v2056_v37 = vld [vmem:[%s2558_s30 + $0x268] sm:$0xff] }
  0xa9   : > { %1376 = vxpose.xlu1.b32.cont [15/16] %v1328_v48, 128  ;;  %v2044_v48 = vld [vmem:[%s2558_s30 + $0x208] sm:$0xff]  ;;  %v571_v57 = vmul.f32 %v2075_v39, %v2587_v13  ;;  %v480_v58 = vmul.f32 %v2050_v42, %v2585_v12  ;;  %v414_v62 = vadd.f32 %v382_v41, %v316_v40  ;;  %v578_v63 = vmul.f32 %v2082_v47, %v2587_v13  ;;  %v2086_v47 = vld [vmem:[%s2558_s30 + $0x358] sm:$0xff] }
  0xaa   : > { %1344 = vxpose.xlu0.b32.cont [15/16] %v1312_v51, 128  ;;  %v2886_v51 = vstv %s2850_s22  ;;  %v408_v0 = vadd.f32 %v376_v44, %v310_v43  ;;  %v474_v1 = vmul.f32 %v2044_v48, %v2585_v12  ;;  %v2903_v5 = vadd.f32 %v574_v30, %v508_v45  ;;  %v2049_v30 = vld [vmem:[%s2558_s30 + $0x230] sm:$0xff]  ;;  %v2051_v44 = vld [vmem:[%s2558_s30 + $0x240] sm:$0xff] }
  0xab   : > { %v2905_v6 = vadd.f32 %v576_v34, %v510_v46  ;;  %v416_v7 = vadd.f32 %v384_v50, %v318_v49  ;;  %v482_v10 = vmul.f32 %v2052_v52, %v2585_v12  ;;  %v477_v17 = vmul.f32 %v2047_v59, %v2585_v12  ;;  %v2026_v34 = vld [vmem:[%s2558_s30 + $0x178] sm:$0xff]  ;;  %v286_v45 = vld [vmem:[%s2558_s30 + $0x50] sm:$0xff] }
  0xac   : > { %v320_v19 = vmul.f32 %v2579_v8, %v287_v60  ;;  %v386_v20 = vmul.f32 %v2022_v61, %v2581_v9  ;;  %v2917_v23 = vadd.f32 %v571_v57, %v505_v56  ;;  %v572_v24 = vmul.f32 %v2076_v2, %v2587_v13  ;;  %v2021_v46 = vld [vmem:[%s2558_s30 + $0x150] sm:$0xff]  ;;  %v2058_v59 = vld [vmem:[%s2558_s30 + $0x278] sm:$0xff]  ;;  %v2088_v60 = vld [vmem:[%s2558_s30 + $0x368] sm:$0xff] }
  0xad   : > { %1377 = vxpose.xlu1.b32.end [16/16] %v1329_v54, 128  ;;  %v379_v54 = vmul.f32 %v2015_v38, %v2581_v9  ;;  %v315_v26 = vmul.f32 %v2579_v8, %v282_v3  ;;  %v381_v27 = vmul.f32 %v2017_v4, %v2581_v9  ;;  %v512_v28 = vadd.f32 %v480_v58, %v414_v62  ;;  %v2081_v50 = vld [vmem:[%s2558_s30 + $0x330] sm:$0xff]  ;;  %v305_v2 = vld [vmem:[%s2558_s30 + $0xe8] sm:$0xff] }
  0xae   : > { %1345 = vxpose.xlu0.b32.end [16/16] %v1313_v55, 128  ;;  %v2891_v55 = vadd.f32 %v573_v29, %v507_v33  ;;  %v506_v29 = vadd.f32 %v474_v1, %v408_v0  ;;  %v322_v31 = vmul.f32 %v2579_v8, %v289_v14  ;;  %v388_v32 = vmul.f32 %v2024_v15, %v2581_v9  ;;  %v291_v33 = vld [vmem:[%s2558_s30 + $0x78] sm:$0xff]  ;;  %v2083_v0 = vld [vmem:[%s2558_s30 + $0x340] sm:$0xff]  ;;  %v2040_v14 = vld [vmem:[%s2558_s30 + $0x1e8] sm:$0xff] }
  0xaf   : > { %v411_v16 = vadd.f32 %v379_v54, %v313_v53  ;;  %v580_v35 = vmul.f32 %v2084_v11, %v2587_v13  ;;  %v575_v36 = vmul.f32 %v2079_v18, %v2587_v13  ;;  %v317_v38 = vmul.f32 %v2579_v8, %v284_v21  ;;  %v2053_v11 = vld [vmem:[%s2558_s30 + $0x250] sm:$0xff]  ;;  %v2072_v21 = vld [vmem:[%s2558_s30 + $0x2e8] sm:$0xff] }
  0xb0   : > { %v383_v39 = vmul.f32 %v2019_v22, %v2581_v9  ;;  %v514_v40 = vadd.f32 %v482_v10, %v416_v7  ;;  %v418_v42 = vadd.f32 %v386_v20, %v320_v19  ;;  %v484_v43 = vmul.f32 %v2054_v25, %v2585_v12  ;;  %v293_v19 = vld [vmem:[%s2558_s30 + $0x88] sm:$0xff] }
  0xb1   : > { %v509_v41 = vadd.f32 %v477_v17, %v411_v16  ;;  %v413_v48 = vadd.f32 %v381_v27, %v315_v26  ;;  %v479_v49 = vmul.f32 %v2049_v30, %v2585_v12  ;;  %v324_v52 = vmul.f32 %v2579_v8, %v291_v33  ;;  %v2028_v20 = vld [vmem:[%s2558_s30 + $0x188] sm:$0xff]  ;;  %v2090_v26 = vld [vmem:[%s2558_s30 + $0x378] sm:$0xff] }
  0xb2   : > { %v390_v53 = vmul.f32 %v2026_v34, %v2581_v9  ;;  %v2946_v54 = vadd.f32 %v578_v63, %v512_v28  ;;  %v2948_v56 = vadd.f32 %v572_v24, %v506_v29  ;;  %v420_v57 = vadd.f32 %v388_v32, %v322_v31  ;;  %v2104_v28 = vld [vmem:[%s2558_s30 + $0x3e8] sm:$0xff]  ;;  %v2085_v32 = vld [vmem:[%s2558_s30 + $0x350] sm:$0xff] }
  0xb3   : > { %v486_v58 = vmul.f32 %v2056_v37, %v2585_v12  ;;  %v415_v61 = vadd.f32 %v383_v39, %v317_v38  ;;  %v481_v62 = vmul.f32 %v2051_v44, %v2585_v12  ;;  %v319_v1 = vmul.f32 %v2579_v8, %v286_v45  ;;  %v307_v38 = vld [vmem:[%s2558_s30 + $0xf8] sm:$0xff] }
  0xb4   : > { %v385_v63 = vmul.f32 %v2021_v46, %v2581_v9  ;;  %v2958_v3 = vadd.f32 %v580_v35, %v514_v40  ;;  %v516_v4 = vadd.f32 %v484_v43, %v418_v42  ;;  %v582_v7 = vmul.f32 %v2086_v47, %v2587_v13  ;;  %v2042_v44 = vld [vmem:[%s2558_s30 + $0x1f8] sm:$0xff] }
  0xb5   : > { %v577_v10 = vmul.f32 %v2081_v50, %v2587_v13  ;;  %v2964_v15 = vadd.f32 %v575_v36, %v509_v41  ;;  %v511_v16 = vadd.f32 %v479_v49, %v413_v48  ;;  %v422_v17 = vadd.f32 %v390_v53, %v324_v52  ;;  %v2060_v41 = vld [vmem:[%s2558_s30 + $0x288] sm:$0xff]  ;;  %v2074_v45 = vld [vmem:[%s2558_s30 + $0x2f8] sm:$0xff]  ;;  %v288_v50 = vld [vmem:[%s2558_s30 + $0x60] sm:$0xff] }
  0xb6   : > { %v488_v18 = vmul.f32 %v2058_v59, %v2585_v12  ;;  %v518_v22 = vadd.f32 %v486_v58, %v420_v57  ;;  %v584_v24 = vmul.f32 %v2088_v60, %v2587_v13  ;;  %v579_v25 = vmul.f32 %v2083_v0, %v2587_v13  ;;  %v2092_v49 = vld [vmem:[%s2558_s30 + $0x388] sm:$0xff]  ;;  %v2023_v57 = vld [vmem:[%s2558_s30 + $0x160] sm:$0xff] }
  0xb7   : > { %v338_v27 = vmul.f32 %v2579_v8, %v305_v2  ;;  %v513_v29 = vadd.f32 %v481_v62, %v415_v61  ;;  %v417_v30 = vadd.f32 %v385_v63, %v319_v1  ;;  %v483_v31 = vmul.f32 %v2053_v11, %v2585_v12  ;;  %v2055_v58 = vld [vmem:[%s2558_s30 + $0x260] sm:$0xff]  ;;  %v2106_v61 = vld [vmem:[%s2558_s30 + $0x3f8] sm:$0xff] }
  0xb8   : > { %v404_v33 = vmul.f32 %v2040_v14, %v2581_v9  ;;  %v2980_v34 = vadd.f32 %v582_v7, %v516_v4  ;;  %v326_v35 = vmul.f32 %v2579_v8, %v293_v19  ;;  %v392_v36 = vmul.f32 %v2028_v20, %v2581_v9  ;;  %v295_v1 = vld [vmem:[%s2558_s30 + $0x98] sm:$0xff]  ;;  %v304_v7 = vld [vmem:[%s2558_s30 + $0xe0] sm:$0xff] }
  0xb9   : > { %v502_v37 = vmul.f32 %v2072_v21, %v2585_v12  ;;  %v520_v39 = vadd.f32 %v488_v18, %v422_v17  ;;  %v586_v40 = vmul.f32 %v2090_v26, %v2587_v13  ;;  %v600_v43 = vmul.f32 %v2104_v28, %v2587_v13  ;;  %v2030_v63 = vld [vmem:[%s2558_s30 + $0x198] sm:$0xff]  ;;  %v2039_v17 = vld [vmem:[%s2558_s30 + $0x1e0] sm:$0xff] }
  0xba   : > { %v436_v42 = vadd.f32 %v404_v33, %v338_v27  ;;  %v2995_v46 = vadd.f32 %v577_v10, %v511_v16  ;;  %v2997_v47 = vadd.f32 %v584_v24, %v518_v22  ;;  %v581_v48 = vmul.f32 %v2085_v32, %v2587_v13  ;;  %v2071_v18 = vld [vmem:[%s2558_s30 + $0x2e0] sm:$0xff]  ;;  %v306_v24 = vld [vmem:[%s2558_s30 + $0xf0] sm:$0xff] }
  0xbb   : > { %v3002_v52 = vadd.f32 %v579_v25, %v513_v29  ;;  %v515_v53 = vadd.f32 %v483_v31, %v417_v30  ;;  %v340_v60 = vmul.f32 %v2579_v8, %v307_v38  ;;  %v3008_v62 = vadd.f32 %v392_v36, %v326_v35  ;;  %v2103_v19 = vld [vmem:[%s2558_s30 + $0x3e0] sm:$0xff]  ;;  %v2041_v25 = vld [vmem:[%s2558_s30 + $0x1f0] sm:$0xff] }
  0xbc   : > { %v534_v59 = vadd.f32 %v502_v37, %v436_v42  ;;  %v3011_v0 = vmul.f32 %v2060_v41, %v2585_v12  ;;  %v406_v2 = vmul.f32 %v2042_v44, %v2581_v9  ;;  %v504_v4 = vmul.f32 %v2074_v45, %v2585_v12  ;;  %v2073_v30 = vld [vmem:[%s2558_s30 + $0x2f0] sm:$0xff]  ;;  %v297_v44 = vld [vmem:[%s2558_s30 + $0xa8] sm:$0xff] }
  0xbd   : > { %v3018_v10 = vadd.f32 %v586_v40, %v520_v39  ;;  %v3021_v11 = vmul.f32 %v2092_v49, %v2587_v13  ;;  %v321_v14 = vmul.f32 %v2579_v8, %v288_v50  ;;  %v387_v20 = vmul.f32 %v2023_v57, %v2581_v9  ;;  %v290_v32 = vld [vmem:[%s2558_s30 + $0x70] sm:$0xff]  ;;  %v2062_v40 = vld [vmem:[%s2558_s30 + $0x298] sm:$0xff]  ;;  %v2032_v45 = vld [vmem:[%s2558_s30 + $0x1a8] sm:$0xff] }
  0xbe   : > { %v3024_v16 = vadd.f32 %v600_v43, %v534_v59  ;;  %v438_v21 = vadd.f32 %v406_v2, %v340_v60  ;;  %v602_v22 = vmul.f32 %v2106_v61, %v2587_v13  ;;  %v3037_v26 = vadd.f32 %v581_v48, %v515_v53  ;;  %v2025_v33 = vld [vmem:[%s2558_s30 + $0x170] sm:$0xff]  ;;  %v2027_v2 = vld [vmem:[%s2558_s30 + $0x180] sm:$0xff] }
  0xbf   : > { %v485_v27 = vmul.f32 %v2055_v58, %v2585_v12  ;;  %v337_v29 = vmul.f32 %v2579_v8, %v304_v7  ;;  %v328_v31 = vmul.f32 %v2579_v8, %v295_v1  ;;  %v403_v36 = vmul.f32 %v2039_v17, %v2581_v9  ;;  %v2105_v38 = vld [vmem:[%s2558_s30 + $0x3f0] sm:$0xff]  ;;  %v2087_v17 = vld [vmem:[%s2558_s30 + $0x360] sm:$0xff] }
  0xc0   : > { %v3042_v28 = vmul.f32 %v2886_v51, %v3024_v16  ;;  %v536_v35 = vadd.f32 %v504_v4, %v438_v21  ;;  %v501_v37 = vmul.f32 %v2071_v18, %v2585_v12  ;;  %v394_v39 = vmul.f32 %v2030_v63, %v2581_v9  ;;  %v2057_v58 = vld [vmem:[%s2558_s30 + $0x270] sm:$0xff]  ;;  %v292_v63 = vld [vmem:[%s2558_s30 + $0x80] sm:$0xff] }
  0xc1   : > { %v599_v41 = vmul.f32 %v2103_v19, %v2587_v13  ;;  %v339_v42 = vmul.f32 %v2579_v8, %v306_v24  ;;  %v405_v43 = vmul.f32 %v2041_v25, %v2581_v9  ;;  %v435_v49 = vadd.f32 %v403_v36, %v337_v29  ;;  %v2094_v19 = vld [vmem:[%s2558_s30 + $0x398] sm:$0xff]  ;;  %v2064_v25 = vld [vmem:[%s2558_s30 + $0x2a8] sm:$0xff] }
  0xc2   : > { %v3063_v48 = vadd.f32 %v602_v22, %v536_v35  ;;  %v503_v50 = vmul.f32 %v2073_v30, %v2585_v12  ;;  %v323_v53 = vmul.f32 %v2579_v8, %v290_v32  ;;  %v389_v57 = vmul.f32 %v2025_v33, %v2581_v9  ;;  %v299_v33 = vld [vmem:[%s2558_s30 + $0xb8] sm:$0xff] }
  0xc3   : > { %v437_v59 = vadd.f32 %v405_v43, %v339_v42  ;;  %v601_v60 = vmul.f32 %v2105_v38, %v2587_v13  ;;  %v419_v61 = vadd.f32 %v387_v20, %v321_v14  ;;  %v492_v1 = vmul.f32 %v2062_v40, %v2585_v12  ;;  %v2034_v35 = vld [vmem:[%s2558_s30 + $0x1b8] sm:$0xff]  ;;  %v2089_v38 = vld [vmem:[%s2558_s30 + $0x370] sm:$0xff] }
  0xc4   : > { %v3075_v4 = vmul.f32 %v2886_v51, %v3063_v48  ;;  %v533_v7 = vadd.f32 %v501_v37, %v435_v49  ;;  %v426_v18 = vadd.f32 %v394_v39, %v328_v31  ;;  %v330_v21 = vmul.f32 %v2579_v8, %v297_v44  ;;  %v2059_v39 = vld [vmem:[%s2558_s30 + $0x280] sm:$0xff]  ;;  %v294_v44 = vld [vmem:[%s2558_s30 + $0x90] sm:$0xff] }
  0xc5   : > { %v396_v22 = vmul.f32 %v2032_v45, %v2581_v9  ;;  %v535_v14 = vadd.f32 %v503_v50, %v437_v59  ;;  %v522_v20 = vadd.f32 %v3011_v0, %v3008_v62  ;;  %v487_v24 = vmul.f32 %v2057_v58, %v2585_v12  ;;  %v2029_v45 = vld [vmem:[%s2558_s30 + $0x190] sm:$0xff]  ;;  %v2096_v50 = vld [vmem:[%s2558_s30 + $0x3a8] sm:$0xff]  ;;  %v2066_v58 = vld [vmem:[%s2558_s30 + $0x2b8] sm:$0xff] }
  0xc6   : > { %v3089_v29 = vadd.f32 %v599_v41, %v533_v7  ;;  %v421_v30 = vadd.f32 %v389_v57, %v323_v53  ;;  %v325_v31 = vmul.f32 %v2579_v8, %v292_v63  ;;  %v391_v32 = vmul.f32 %v2027_v2, %v2581_v9  ;;  %v301_v63 = vld [vmem:[%s2558_s30 + $0xc8] sm:$0xff] }
  0xc7   : > { %v3095_v36 = vadd.f32 %v601_v60, %v535_v14  ;;  %v517_v37 = vadd.f32 %v485_v27, %v419_v61  ;;  %v583_v62 = vmul.f32 %v2087_v17, %v2587_v13  ;;  %v590_v0 = vmul.f32 %v2094_v19, %v2587_v13  ;;  %v2036_v2 = vld [vmem:[%s2558_s30 + $0x1c8] sm:$0xff]  ;;  %v2098_v17 = vld [vmem:[%s2558_s30 + $0x3b8] sm:$0xff] }
  0xc8   : > { %v3103_v40 = vmul.f32 %v2886_v51, %v3089_v29  ;;  %v524_v41 = vadd.f32 %v492_v1, %v426_v18  ;;  %v428_v42 = vadd.f32 %v396_v22, %v330_v21  ;;  %v494_v43 = vmul.f32 %v2064_v25, %v2585_v12  ;;  %v296_v25 = vld [vmem:[%s2558_s30 + $0xa0] sm:$0xff] }
  0xc9   : > { %v3110_v27 = vmul.f32 %v2886_v51, %v3095_v36  ;;  %v3117_v49 = vadd.f32 %v3021_v11, %v522_v20  ;;  %v332_v53 = vmul.f32 %v2579_v8, %v299_v33  ;;  %v398_v57 = vmul.f32 %v2034_v35, %v2581_v9  ;;  %v2091_v11 = vld [vmem:[%s2558_s30 + $0x380] sm:$0xff]  ;;  %v303_v35 = vld [vmem:[%s2558_s30 + $0xd8] sm:$0xff] }
  0xca   : > { %v519_v59 = vadd.f32 %v487_v24, %v421_v30  ;;  %v585_v60 = vmul.f32 %v2089_v38, %v2587_v13  ;;  %v423_v61 = vadd.f32 %v391_v32, %v325_v31  ;;  %v489_v1 = vmul.f32 %v2059_v39, %v2585_v12  ;;  %v2061_v24 = vld [vmem:[%s2558_s30 + $0x290] sm:$0xff]  ;;  %v2031_v30 = vld [vmem:[%s2558_s30 + $0x1a0] sm:$0xff]  ;;  %v2068_v39 = vld [vmem:[%s2558_s30 + $0x2c8] sm:$0xff] }
  0xcb   : > { %671 = vrot.lane.b32.xlu1 %v2891_v55, %s2405_s9  ;;  %v3127_v7 = vadd.f32 %v583_v62, %v517_v37  ;;  %v327_v18 = vmul.f32 %v2579_v8, %v294_v44  ;;  %v393_v19 = vmul.f32 %v2029_v45, %v2581_v9  ;;  %v3133_v21 = vadd.f32 %v590_v0, %v524_v41  ;;  %v2038_v37 = vld [vmem:[%s2558_s30 + $0x1d8] sm:$0xff] }
  0xcc   : > { %v526_v22 = vadd.f32 %v494_v43, %v428_v42  ;;  %v592_v14 = vmul.f32 %v2096_v50, %v2587_v13  ;;  %v496_v20 = vmul.f32 %v2066_v58, %v2585_v12  ;;  %v430_v31 = vadd.f32 %v398_v57, %v332_v53  ;;  %v2093_v53 = vld [vmem:[%s2558_s30 + $0x390] sm:$0xff]  ;;  %v2063_v57 = vld [vmem:[%s2558_s30 + $0x2a0] sm:$0xff] }
  0xcd   : > { %v334_v32 = vmul.f32 %v2579_v8, %v301_v63  ;;  %v400_v33 = vmul.f32 %v2036_v2, %v2581_v9  ;;  %v3148_v62 = vadd.f32 %v585_v60, %v519_v59  ;;  %v521_v0 = vadd.f32 %v489_v1, %v423_v61  ;;  %v2070_v60 = vld [vmem:[%s2558_s30 + $0x2d8] sm:$0xff]  ;;  %v298_v2 = vld [vmem:[%s2558_s30 + $0xb0] sm:$0xff] }
  0xce   : > { %v587_v38 = vmul.f32 %v2091_v11, %v2587_v13  ;;  %v425_v41 = vadd.f32 %v393_v19, %v327_v18  ;;  %v491_v42 = vmul.f32 %v2061_v24, %v2585_v12  ;;  %v329_v43 = vmul.f32 %v2579_v8, %v296_v25  ;;  %v2033_v11 = vld [vmem:[%s2558_s30 + $0x1b0] sm:$0xff]  ;;  %v2100_v18 = vld [vmem:[%s2558_s30 + $0x3c8] sm:$0xff] }
  0xcf   : > { %673 = vrot.lane.b32.xlu1 %v2903_v5, %s2405_s9  ;;  %v395_v44 = vmul.f32 %v2031_v30, %v2581_v9  ;;  %v3155_v45 = vadd.f32 %v592_v14, %v526_v22  ;;  %v594_v50 = vmul.f32 %v2098_v17, %v2587_v13  ;;  %v336_v58 = vmul.f32 %v2579_v8, %v303_v35 }
  0xd0   : > { %v402_v59 = vmul.f32 %v2038_v37, %v2581_v9  ;;  %v528_v61 = vadd.f32 %v496_v20, %v430_v31  ;;  %v432_v1 = vadd.f32 %v400_v33, %v334_v32  ;;  %v498_v63 = vmul.f32 %v2068_v39, %v2585_v12  ;;  %v2095_v20 = vld [vmem:[%s2558_s30 + $0x3a0] sm:$0xff]  ;;  %v2102_v32 = vld [vmem:[%s2558_s30 + $0x3d8] sm:$0xff] }
  0xd1   : > { %v3170_v17 = vadd.f32 %v587_v38, %v521_v0  ;;  %v523_v19 = vadd.f32 %v491_v42, %v425_v41  ;;  %v589_v22 = vmul.f32 %v2093_v53, %v2587_v13  ;;  %v427_v24 = vadd.f32 %v395_v44, %v329_v43  ;;  %v2065_v41 = vld [vmem:[%s2558_s30 + $0x2b0] sm:$0xff]  ;;  %v300_v42 = vld [vmem:[%s2558_s30 + $0xc0] sm:$0xff] }
  0xd2   : > { %v493_v25 = vmul.f32 %v2063_v57, %v2585_v12  ;;  %v434_v30 = vadd.f32 %v402_v59, %v336_v58  ;;  %v500_v31 = vmul.f32 %v2070_v60, %v2585_v12  ;;  %v331_v33 = vmul.f32 %v2579_v8, %v298_v2  ;;  %v2035_v43 = vld [vmem:[%s2558_s30 + $0x1c0] sm:$0xff] }
  0xd3   : > { %677 = vrot.lane.b32.xlu1 %v2905_v6, %s2405_s9  ;;  %v397_v35 = vmul.f32 %v2033_v11, %v2581_v9  ;;  %v3188_v0 = vadd.f32 %v594_v50, %v528_v61  ;;  %v530_v38 = vadd.f32 %v498_v63, %v432_v1  ;;  %v596_v39 = vmul.f32 %v2100_v18, %v2587_v13  ;;  %v2097_v1 = vld [vmem:[%s2558_s30 + $0x3b0] sm:$0xff] }
  0xd4   : > { %v3194_v44 = vadd.f32 %v589_v22, %v523_v19  ;;  %v591_v53 = vmul.f32 %v2095_v20, %v2587_v13  ;;  %v598_v57 = vmul.f32 %v2102_v32, %v2587_v13  ;;  %v525_v59 = vadd.f32 %v493_v25, %v427_v24  ;;  %v2067_v19 = vld [vmem:[%s2558_s30 + $0x2c0] sm:$0xff]  ;;  %v302_v22 = vld [vmem:[%s2558_s30 + $0xd0] sm:$0xff] }
  0xd5   : > { %v532_v50 = vadd.f32 %v500_v31, %v434_v30  ;;  %v429_v60 = vadd.f32 %v397_v35, %v331_v33  ;;  %v495_v61 = vmul.f32 %v2065_v41, %v2585_v12  ;;  %v3208_v2 = vadd.f32 %v596_v39, %v530_v38  ;;  %v2037_v24 = vld [vmem:[%s2558_s30 + $0x1d0] sm:$0xff]  ;;  %v2099_v39 = vld [vmem:[%s2558_s30 + $0x3c0] sm:$0xff] }
  0xd6   : > { %v333_v11 = vmul.f32 %v2579_v8, %v300_v42  ;;  %v399_v18 = vmul.f32 %v2035_v43, %v2581_v9  ;;  %v593_v25 = vmul.f32 %v2097_v1, %v2587_v13  ;;  %v3218_v30 = vadd.f32 %v591_v53, %v525_v59  ;;  %v2069_v43 = vld [vmem:[%s2558_s30 + $0x2d0] sm:$0xff] }
  0xd7   : > { %667 = vrot.lane.b32.xlu0 %v2917_v23, %s2405_s9  ;;  %681 = vrot.lane.b32.xlu1 %v2946_v54, %s2405_s9  ;;  %v3220_v31 = vadd.f32 %v598_v57, %v532_v50  ;;  %v527_v32 = vadd.f32 %v495_v61, %v429_v60  ;;  %v497_v33 = vmul.f32 %v2067_v19, %v2585_v12 }
  0xd8   : > { %v431_v38 = vadd.f32 %v399_v18, %v333_v11  ;;  %v335_v41 = vmul.f32 %v2579_v8, %v302_v22  ;;  %v401_v42 = vmul.f32 %v2037_v24, %v2581_v9  ;;  %v595_v59 = vmul.f32 %v2099_v39, %v2587_v13  ;;  %v2101_v9 = vld [vmem:[%s2558_s30 + $0x3d0] sm:$0xff] }
  0xd9   : > { %v3235_v57 = vadd.f32 %v593_v25, %v527_v32  ;;  %v499_v8 = vmul.f32 %v2069_v43, %v2585_v12  ;;  %v597_v22 = vmul.f32 %v2101_v9, %v2587_v13 }
  0xda   : > { %v529_v60 = vadd.f32 %v497_v33, %v431_v38  ;;  %v433_v61 = vadd.f32 %v401_v42, %v335_v41 }
  0xdb   : > { %669 = vrot.lane.b32.xlu0 %v2948_v56, %s2405_s9  ;;  %685 = vrot.lane.b32.xlu1 %v2958_v3, %s2405_s9 }
  0xdc   : > { %v3254_v18 = vadd.f32 %v595_v59, %v529_v60  ;;  %v531_v19 = vadd.f32 %v499_v8, %v433_v61 }
  0xde   : > { %v3263_v12 = vadd.f32 %v597_v22, %v531_v19 }
  0xdf   : > { %675 = vrot.lane.b32.xlu0 %v2964_v15, %s2405_s9  ;;  %689 = vrot.lane.b32.xlu1 %v2980_v34, %s2405_s9 }
  0xe3   : > { %679 = vrot.lane.b32.xlu0 %v2995_v46, %s2405_s9  ;;  %693 = vrot.lane.b32.xlu1 %v2997_v47, %s2405_s9 }
  0xe7   : > { %683 = vrot.lane.b32.xlu0 %v3002_v52, %s2405_s9  ;;  %697 = vrot.lane.b32.xlu1 %v3018_v10, %s2405_s9 }
  0xeb   : > { %687 = vrot.lane.b32.xlu0 %v3037_v26, %s2405_s9  ;;  %701 = vrot.lane.b32.xlu1 %v3117_v49, %s2405_s9 }
  0xef   : > { %691 = vrot.lane.b32.xlu0 %v3127_v7, %s2405_s9  ;;  %705 = vrot.lane.b32.xlu1 %v3133_v21, %s2405_s9 }
  0xf1   : > { %v3174_v14 = vpop.trf.xlu1 }
  0xf2   : > { %v3182_v37 = vpop.trf.xlu0 }
  0xf3   : > { %695 = vrot.lane.b32.xlu0 %v3148_v62, %s2405_s9  ;;  %709 = vrot.lane.b32.xlu1 %v3155_v45, %s2405_s9 }
  0xf5   : > { %v3198_v58 = vpop.trf.xlu1 }
  0xf6   : > { %v3202_v63 = vpop.trf.xlu0 }
  0xf7   : > { %699 = vrot.lane.b32.xlu0 %v3170_v17, %s2405_s9  ;;  %713 = vrot.lane.b32.xlu1 %v3188_v0, %s2405_s9 }
  0xf9   : > { %v3216_v20 = vpop.trf.xlu1 }
  0xfa   : > { %v3223_v35 = vpop.trf.xlu0 }
  0xfb   : > { %703 = vrot.lane.b32.xlu0 %v3194_v44, %s2405_s9  ;;  %717 = vrot.lane.b32.xlu1 %v3208_v2, %s2405_s9 }
  0xfd   : > { %v3233_v53 = vpop.trf.xlu1 }
  0xfe   : > { %v3238_v50 = vpop.trf.xlu0 }
  0xff   : > { %707 = vrot.lane.b32.xlu0 %v3218_v30, %s2405_s9  ;;  %721 = vrot.lane.b32.xlu1 %v3220_v31, %s2405_s9 }
 0x101   : > { %v3246_v1 = vpop.trf.xlu1 }
 0x102   : > { %v3248_v11 = vpop.trf.xlu0 }
 0x103   : > { %711 = vrot.lane.b32.xlu0 %v3235_v57, %s2405_s9  ;;  %725 = vrot.lane.b32.xlu1 %v3024_v16, %s2405_s9 }
 0x105   : > { %v3257_v24 = vpop.trf.xlu1 }
 0x106   : > { %v3265_v25 = vpop.trf.xlu0 }
 0x107   : > { %715 = vrot.lane.b32.xlu0 %v3254_v18, %s2405_s9  ;;  %729 = vrot.lane.b32.xlu1 %v3063_v48, %s2405_s9 }
 0x109   : > { %v3267_v32 = vpop.trf.xlu1 }
 0x10a   : > { %v3275_v16 = vpop.trf.xlu0 }
 0x10b   : > { %719 = vrot.lane.b32.xlu0 %v3263_v12, %s2405_s9  ;;  %1428 = vrot.lane.b32.xlu1 %v3174_v14, %s2405_s9  ;;  %3950 = vst [vmem:[#allocation16_spill] sm:$0xff] %v3275_v16 }
 0x10d   : > { %v3273_v13 = vpop.trf.xlu1 }
 0x10e   : > { %3949 = vst [vmem:[#allocation15_spill] sm:$0xff] %v3273_v13  ;;  %v3287_v33 = vpop.trf.xlu0 }
 0x10f   : > { %723 = vrot.lane.b32.xlu0 %v3089_v29, %s2405_s9  ;;  %1432 = vrot.lane.b32.xlu1 %v3198_v58, %s2405_s9  ;;  %3952 = vst [vmem:[#allocation18_spill] sm:$0xff] %v3287_v33 }
 0x111   : > { %v3281_v48 = vpop.trf.xlu1 }
 0x112   : > { %3951 = vst [vmem:[#allocation17_spill] sm:$0xff] %v3281_v48  ;;  %v3297_v39 = vpop.trf.xlu0 }
 0x113   : > { %727 = vrot.lane.b32.xlu0 %v3095_v36, %s2405_s9  ;;  %1436 = vrot.lane.b32.xlu1 %v3216_v20, %s2405_s9  ;;  %3955 = vst [vmem:[#allocation21_spill] sm:$0xff] %v3297_v39 }
 0x115   : > { %v3289_v38 = vpop.trf.xlu1 }
 0x116   : > { %3953 = vst [vmem:[#allocation19_spill] sm:$0xff] %v3289_v38  ;;  %v3309_v41 = vpop.trf.xlu0 }
 0x117   : > { %1426 = vrot.lane.b32.xlu0 %v3182_v37, %s2405_s9  ;;  %1440 = vrot.lane.b32.xlu1 %v3233_v53, %s2405_s9  ;;  %3957 = vst [vmem:[#allocation23_spill] sm:$0xff] %v3309_v41 }
 0x119   : > { %v3295_v29 = vpop.trf.xlu1 }
 0x11a   : > { %3954 = vst [vmem:[#allocation20_spill] sm:$0xff] %v3295_v29  ;;  %v3317_v43 = vpop.trf.xlu0 }
 0x11b   : > { %1430 = vrot.lane.b32.xlu0 %v3202_v63, %s2405_s9  ;;  %1444 = vrot.lane.b32.xlu1 %v3246_v1, %s2405_s9  ;;  %3959 = vst [vmem:[#allocation25_spill] sm:$0xff] %v3317_v43 }
 0x11d   : > { %v3307_v36 = vpop.trf.xlu1 }
 0x11e   : > { %3956 = vst [vmem:[#allocation22_spill] sm:$0xff] %v3307_v36  ;;  %v3329_v60 = vpop.trf.xlu0 }
 0x11f   : > { %1434 = vrot.lane.b32.xlu0 %v3223_v35, %s2405_s9  ;;  %1448 = vrot.lane.b32.xlu1 %v3257_v24, %s2405_s9 }
 0x121   : > { %v3315_v42 = vpop.trf.xlu1 }
 0x122   : > { %3958 = vst [vmem:[#allocation24_spill] sm:$0xff] %v3315_v42  ;;  %v3337_v8 = vpop.trf.xlu0 }
 0x123   : > { %1438 = vrot.lane.b32.xlu0 %v3238_v50, %s2405_s9  ;;  %1452 = vrot.lane.b32.xlu1 %v3267_v32, %s2405_s9  ;;  %3962 = vst [vmem:[#allocation28_spill] sm:$0xff] %v3337_v8 }
 0x125   : > { %v3327_v59 = vpop.trf.xlu1 }
 0x126   : > { %3960 = vst [vmem:[#allocation26_spill] sm:$0xff] %v3327_v59  ;;  %v3349_v19 = vpop.trf.xlu0 }
 0x127   : > { %1442 = vrot.lane.b32.xlu0 %v3248_v11, %s2405_s9  ;;  %1456 = vrot.lane.b32.xlu1 %v3273_v13, %s2405_s9  ;;  %3964 = vst [vmem:[#allocation30_spill] sm:$0xff] %v3349_v19 }
 0x129   : > { %v3335_v61 = vpop.trf.xlu1 }
 0x12a   : > { %3961 = vst [vmem:[#allocation27_spill] sm:$0xff] %v3335_v61 }
 0x12b   : > { %1446 = vrot.lane.b32.xlu0 %v3265_v25, %s2405_s9  ;;  %1460 = vrot.lane.b32.xlu1 %v3281_v48, %s2405_s9 }
 0x12d   : > { %v3347_v9 = vpop.trf.xlu1 }
 0x12e   : > { %3963 = vst [vmem:[#allocation29_spill] sm:$0xff] %v3347_v9 }
 0x12f   : > { %1450 = vrot.lane.b32.xlu0 %v3275_v16, %s2405_s9  ;;  %1464 = vrot.lane.b32.xlu1 %v3289_v38, %s2405_s9  ;;  %v815_v38 = vmul.f32 %v2886_v51, %v2891_v55 }
 0x133   : > { %1454 = vrot.lane.b32.xlu0 %v3287_v33, %s2405_s9  ;;  %1468 = vrot.lane.b32.xlu1 %v3295_v29, %s2405_s9  ;;  %v3355_v29 = vpop.trf.xlu0 }
 0x134   : > { %3965 = vst [vmem:[#allocation31_spill] sm:$0xff] %v3355_v29 }
 0x137   : > { %1458 = vrot.lane.b32.xlu0 %v3297_v39, %s2405_s9  ;;  %1472 = vrot.lane.b32.xlu1 %v3307_v36, %s2405_s9  ;;  %v3361_v36 = vstv %s2006_s12  ;;  %v3376_v55 = vpop.trf.xlu0 }
 0x13b   : > { %1462 = vrot.lane.b32.xlu0 %v3309_v41, %s2405_s9  ;;  %1476 = vrot.lane.b32.xlu1 %v3315_v42, %s2405_s9  ;;  %v816_v41 = vmul.f32 %v2886_v51, %v2903_v5 }
 0x13d   : > { %v672_v22 = vpop.permute.xlu1 %671 }
 0x13f   : > { %1466 = vrot.lane.b32.xlu0 %v3317_v43, %s2405_s9  ;;  %1480 = vrot.lane.b32.xlu1 %v3327_v59, %s2405_s9  ;;  %v3378_v59 = vstv %s2007_s26 }
 0x141   : > { %v674_v42 = vpop.permute.xlu1 %673 }
 0x142   : > { %v733_v39 = vsel %vm731_vm0, %v672_v22, %v674_v42  ;;  %v797_v48 = vsel %vm731_vm0, %v674_v42, %v672_v22 }
 0x143   : > { %v848_v43 = vmul.f32 %v3361_v36, %v733_v39  ;;  %v849_v33 = vmul.f32 %v3361_v36, %v797_v48  ;;  %1470 = vrot.lane.b32.xlu0 %v3329_v60, %s2405_s9  ;;  %1484 = vrot.lane.b32.xlu1 %v3335_v61, %s2405_s9 }
 0x145   : > { %v880_v5 = vadd.f32 %v848_v43, %v815_v38  ;;  %v881_v13 = vadd.f32 %v849_v33, %v816_v41  ;;  %v678_v16 = vpop.permute.xlu1 %677  ;;  %v814_v33 = vmul.f32 %v2886_v51, %v2948_v56  ;;  %v817_v56 = vmul.f32 %v2886_v51, %v2964_v15 }
 0x146   : > { %v820_v15 = vmul.f32 %v2886_v51, %v2946_v54 }
 0x147   : > { %v913_v42 = vadd.f32 %v3378_v59, %v880_v5  ;;  %v914_v22 = vadd.f32 %v3378_v59, %v881_v13  ;;  %1474 = vrot.lane.b32.xlu0 %v3337_v8, %s2405_s9  ;;  %1488 = vrot.lane.b32.xlu1 %v3347_v9, %s2405_s9  ;;  %v813_v13 = vmul.f32 %v2886_v51, %v2917_v23 }
 0x148   : > { %v818_v23 = vmul.f32 %v2886_v51, %v2905_v6 }
 0x149   : > { %945 = vst [vmem:[%s3386_s28 + $0x10] sm:$0xff] %v913_v42  ;;  %946 = vst [vmem:[%s3386_s28 + $0x18] sm:$0xff] %v914_v22  ;;  %v668_v48 = vpop.permute.xlu0 %667  ;;  %v682_v38 = vpop.permute.xlu1 %681 }
 0x14b   : > { %1478 = vrot.lane.b32.xlu0 %v3349_v19, %s2405_s9 }
 0x14d   : > { %v670_v39 = vpop.permute.xlu0 %669  ;;  %v686_v41 = vpop.permute.xlu1 %685 }
 0x14e   : > { %v732_v43 = vsel %vm731_vm0, %v668_v48, %v670_v39  ;;  %v796_v5 = vsel %vm731_vm0, %v670_v39, %v668_v48 }
 0x14f   : > { %v846_v42 = vmul.f32 %v3361_v36, %v732_v43  ;;  %v847_v22 = vmul.f32 %v3361_v36, %v796_v5  ;;  %1482 = vrot.lane.b32.xlu0 %v3355_v29, %s2405_s9 }
 0x151   : > { %v878_v9 = vadd.f32 %v846_v42, %v813_v13  ;;  %v879_v61 = vadd.f32 %v847_v22, %v814_v33  ;;  %v676_v19 = vpop.permute.xlu0 %675  ;;  %v690_v8 = vpop.permute.xlu1 %689  ;;  %v819_v13 = vmul.f32 %v2886_v51, %v2995_v46  ;;  %v822_v46 = vmul.f32 %v2886_v51, %v2958_v3 }
 0x152   : > { %v734_v48 = vsel %vm731_vm0, %v676_v19, %v678_v16  ;;  %v798_v39 = vsel %vm731_vm0, %v678_v16, %v676_v19 }
 0x153   : > { %v911_v43 = vadd.f32 %v3378_v59, %v878_v9  ;;  %v912_v5 = vadd.f32 %v3378_v59, %v879_v61  ;;  %v850_v29 = vmul.f32 %v3361_v36, %v734_v48  ;;  %v851_v6 = vmul.f32 %v3361_v36, %v798_v39  ;;  %1486 = vrot.lane.b32.xlu0 %v3376_v55, %s2405_s9 }
 0x155   : > { %943 = vst [vmem:[%s3386_s28] sm:$0xff] %v911_v43  ;;  %944 = vst [vmem:[%s3386_s28 + $0x8] sm:$0xff] %v912_v5  ;;  %v882_v16 = vadd.f32 %v850_v29, %v817_v56  ;;  %v883_v9 = vadd.f32 %v851_v6, %v818_v23  ;;  %v680_v61 = vpop.permute.xlu0 %679  ;;  %v694_v19 = vpop.permute.xlu1 %693  ;;  %v821_v29 = vmul.f32 %v2886_v51, %v3002_v52 }
 0x156   : > { %v735_v33 = vsel %vm731_vm0, %v680_v61, %v682_v38  ;;  %v799_v42 = vsel %vm731_vm0, %v682_v38, %v680_v61  ;;  %v824_v52 = vmul.f32 %v2886_v51, %v2980_v34 }
 0x157   : > { %v915_v22 = vadd.f32 %v3378_v59, %v882_v16  ;;  %v916_v48 = vadd.f32 %v3378_v59, %v883_v9  ;;  %v852_v54 = vmul.f32 %v3361_v36, %v735_v33  ;;  %v853_v39 = vmul.f32 %v3361_v36, %v799_v42 }
 0x159   : > { %947 = vst [vmem:[%s3386_s28 + $0x20] sm:$0xff] %v915_v22  ;;  %948 = vst [vmem:[%s3386_s28 + $0x28] sm:$0xff] %v916_v48  ;;  %v884_v23 = vadd.f32 %v852_v54, %v819_v13  ;;  %v885_v38 = vadd.f32 %v853_v39, %v820_v15  ;;  %v684_v56 = vpop.permute.xlu0 %683  ;;  %v698_v43 = vpop.permute.xlu1 %697  ;;  %v823_v15 = vmul.f32 %v2886_v51, %v3037_v26 }
 0x15a   : > { %v736_v5 = vsel %vm731_vm0, %v684_v56, %v686_v41  ;;  %v800_v6 = vsel %vm731_vm0, %v686_v41, %v684_v56  ;;  %v826_v26 = vmul.f32 %v2886_v51, %v2997_v47 }
 0x15b   : > { %v917_v16 = vadd.f32 %v3378_v59, %v884_v23  ;;  %v918_v9 = vadd.f32 %v3378_v59, %v885_v38  ;;  %v854_v3 = vmul.f32 %v3361_v36, %v736_v5  ;;  %v855_v61 = vmul.f32 %v3361_v36, %v800_v6 }
 0x15d   : > { %949 = vst [vmem:[%s3386_s28 + $0x30] sm:$0xff] %v917_v16  ;;  %950 = vst [vmem:[%s3386_s28 + $0x38] sm:$0xff] %v918_v9  ;;  %v886_v13 = vadd.f32 %v854_v3, %v821_v29  ;;  %v887_v41 = vadd.f32 %v855_v61, %v822_v46  ;;  %v688_v33 = vpop.permute.xlu0 %687  ;;  %v702_v42 = vpop.permute.xlu1 %701  ;;  %v825_v46 = vmul.f32 %v2886_v51, %v3127_v7 }
 0x15e   : > { %v737_v22 = vsel %vm731_vm0, %v688_v33, %v690_v8  ;;  %v801_v48 = vsel %vm731_vm0, %v690_v8, %v688_v33  ;;  %v828_v7 = vmul.f32 %v2886_v51, %v3018_v10  ;;  %v827_v61 = vmul.f32 %v2886_v51, %v3148_v62 }
 0x15f   : > { %v919_v54 = vadd.f32 %v3378_v59, %v886_v13  ;;  %v920_v39 = vadd.f32 %v3378_v59, %v887_v41  ;;  %v856_v34 = vmul.f32 %v3361_v36, %v737_v22  ;;  %v857_v23 = vmul.f32 %v3361_v36, %v801_v48 }
 0x160   : > { %v830_v62 = vmul.f32 %v2886_v51, %v3117_v49 }
 0x161   : > { %951 = vst [vmem:[%s3386_s28 + $0x40] sm:$0xff] %v919_v54  ;;  %952 = vst [vmem:[%s3386_s28 + $0x48] sm:$0xff] %v920_v39  ;;  %v888_v29 = vadd.f32 %v856_v34, %v823_v15  ;;  %v889_v8 = vadd.f32 %v857_v23, %v824_v52  ;;  %v692_v38 = vpop.permute.xlu0 %691  ;;  %v706_v56 = vpop.permute.xlu1 %705  ;;  %v829_v39 = vmul.f32 %v2886_v51, %v3170_v17 }
 0x162   : > { %v738_v5 = vsel %vm731_vm0, %v692_v38, %v694_v19  ;;  %v802_v6 = vsel %vm731_vm0, %v694_v19, %v692_v38  ;;  %v832_v17 = vmul.f32 %v2886_v51, %v3133_v21 }
 0x163   : > { %v921_v16 = vadd.f32 %v3378_v59, %v888_v29  ;;  %v922_v9 = vadd.f32 %v3378_v59, %v889_v8  ;;  %v858_v47 = vmul.f32 %v3361_v36, %v738_v5  ;;  %v859_v3 = vmul.f32 %v3361_v36, %v802_v6 }
 0x164   : > { %v831_v6 = vmul.f32 %v2886_v51, %v3194_v44  ;;  %v834_v44 = vmul.f32 %v2886_v51, %v3155_v45 }
 0x165   : > { %953 = vst [vmem:[%s3386_s28 + $0x50] sm:$0xff] %v921_v16  ;;  %954 = vst [vmem:[%s3386_s28 + $0x58] sm:$0xff] %v922_v9  ;;  %v890_v52 = vadd.f32 %v858_v47, %v825_v46  ;;  %v891_v19 = vadd.f32 %v859_v3, %v826_v26  ;;  %v696_v15 = vpop.permute.xlu0 %695  ;;  %v710_v13 = vpop.permute.xlu1 %709 }
 0x166   : > { %v739_v41 = vsel %vm731_vm0, %v696_v15, %v698_v43  ;;  %v803_v33 = vsel %vm731_vm0, %v698_v43, %v696_v15  ;;  %v833_v15 = vmul.f32 %v2886_v51, %v3218_v30  ;;  %v836_v30 = vmul.f32 %v2886_v51, %v3188_v0 }
 0x167   : > { %v923_v22 = vadd.f32 %v3378_v59, %v890_v52  ;;  %v924_v48 = vadd.f32 %v3378_v59, %v891_v19  ;;  %v860_v10 = vmul.f32 %v3361_v36, %v739_v41  ;;  %v861_v54 = vmul.f32 %v3361_v36, %v803_v33 }
 0x169   : > { %955 = vst [vmem:[%s3386_s28 + $0x60] sm:$0xff] %v923_v22  ;;  %956 = vst [vmem:[%s3386_s28 + $0x68] sm:$0xff] %v924_v48  ;;  %v892_v34 = vadd.f32 %v860_v10, %v827_v61  ;;  %v893_v43 = vadd.f32 %v861_v54, %v828_v7  ;;  %v700_v23 = vpop.permute.xlu0 %699  ;;  %v714_v26 = vpop.permute.xlu1 %713 }
 0x16a   : > { %v740_v46 = vsel %vm731_vm0, %v700_v23, %v702_v42  ;;  %v804_v29 = vsel %vm731_vm0, %v702_v42, %v700_v23 }
 0x16b   : > { %v925_v8 = vadd.f32 %v3378_v59, %v892_v34  ;;  %v926_v38 = vadd.f32 %v3378_v59, %v893_v43  ;;  %v862_v49 = vmul.f32 %v3361_v36, %v740_v46  ;;  %v863_v5 = vmul.f32 %v3361_v36, %v804_v29 }
 0x16c   : > { %v835_v34 = vmul.f32 %v2886_v51, %v3235_v57  ;;  %v838_v57 = vmul.f32 %v2886_v51, %v3208_v2 }
 0x16d   : > { %957 = vst [vmem:[%s3386_s28 + $0x70] sm:$0xff] %v925_v8  ;;  %958 = vst [vmem:[%s3386_s28 + $0x78] sm:$0xff] %v926_v38  ;;  %v894_v16 = vadd.f32 %v862_v49, %v829_v39  ;;  %v895_v42 = vadd.f32 %v863_v5, %v830_v62  ;;  %v704_v9 = vpop.permute.xlu0 %703  ;;  %v718_v47 = vpop.permute.xlu1 %717 }
 0x16e   : > { %v741_v3 = vsel %vm731_vm0, %v704_v9, %v706_v56  ;;  %v805_v7 = vsel %vm731_vm0, %v706_v56, %v704_v9 }
 0x16f   : > { %v927_v61 = vadd.f32 %v3378_v59, %v894_v16  ;;  %v928_v52 = vadd.f32 %v3378_v59, %v895_v42  ;;  %v864_v21 = vmul.f32 %v3361_v36, %v741_v3  ;;  %v865_v19 = vmul.f32 %v3361_v36, %v805_v7 }
 0x171   : > { %959 = vst [vmem:[%s3386_s28 + $0x80] sm:$0xff] %v927_v61  ;;  %960 = vst [vmem:[%s3386_s28 + $0x88] sm:$0xff] %v928_v52  ;;  %v896_v41 = vadd.f32 %v864_v21, %v831_v6  ;;  %v897_v56 = vadd.f32 %v865_v19, %v832_v17  ;;  %v708_v33 = vpop.permute.xlu0 %707  ;;  %v722_v22 = vpop.permute.xlu1 %721  ;;  %v837_v17 = vmul.f32 %v2886_v51, %v3254_v18 }
 0x172   : > { %v742_v48 = vsel %vm731_vm0, %v708_v33, %v710_v13  ;;  %v806_v10 = vsel %vm731_vm0, %v710_v13, %v708_v33  ;;  %v840_v18 = vmul.f32 %v2886_v51, %v3220_v31  ;;  %v839_v21 = vmul.f32 %v2886_v51, %v3263_v12 }
 0x173   : > { %v929_v54 = vadd.f32 %v3378_v59, %v896_v41  ;;  %v930_v62 = vadd.f32 %v3378_v59, %v897_v56  ;;  %v866_v45 = vmul.f32 %v3361_v36, %v742_v48  ;;  %v867_v39 = vmul.f32 %v3361_v36, %v806_v10 }
 0x175   : > { %961 = vst [vmem:[%s3386_s28 + $0x90] sm:$0xff] %v929_v54  ;;  %962 = vst [vmem:[%s3386_s28 + $0x98] sm:$0xff] %v930_v62  ;;  %v898_v43 = vadd.f32 %v866_v45, %v833_v15  ;;  %v899_v13 = vadd.f32 %v867_v39, %v834_v44  ;;  %v712_v23 = vpop.permute.xlu0 %711  ;;  %v726_v46 = vpop.permute.xlu1 %725 }
 0x176   : > { %v743_v29 = vsel %vm731_vm0, %v712_v23, %v714_v26  ;;  %v807_v8 = vsel %vm731_vm0, %v714_v26, %v712_v23 }
 0x177   : > { %v931_v38 = vadd.f32 %v3378_v59, %v898_v43  ;;  %v932_v49 = vadd.f32 %v3378_v59, %v899_v13  ;;  %v868_v0 = vmul.f32 %v3361_v36, %v743_v29  ;;  %v869_v5 = vmul.f32 %v3361_v36, %v807_v8 }
 0x179   : > { %963 = vst [vmem:[%s3386_s28 + $0xa0] sm:$0xff] %v931_v38  ;;  %964 = vst [vmem:[%s3386_s28 + $0xa8] sm:$0xff] %v932_v49  ;;  %v900_v6 = vadd.f32 %v868_v0, %v835_v34  ;;  %v901_v26 = vadd.f32 %v869_v5, %v836_v30  ;;  %v716_v16 = vpop.permute.xlu0 %715  ;;  %v730_v42 = vpop.permute.xlu1 %729 }
 0x17a   : > { %v744_v9 = vsel %vm731_vm0, %v716_v16, %v718_v47  ;;  %v808_v3 = vsel %vm731_vm0, %v718_v47, %v716_v16 }
 0x17b   : > { %v933_v7 = vadd.f32 %v3378_v59, %v900_v6  ;;  %v934_v61 = vadd.f32 %v3378_v59, %v901_v26  ;;  %v870_v2 = vmul.f32 %v3361_v36, %v744_v9  ;;  %v871_v52 = vmul.f32 %v3361_v36, %v808_v3 }
 0x17c   : > { %v3566_v6 = vstv %s2009_s5 }
 0x17d   : > { %965 = vst [vmem:[%s3386_s28 + $0xb0] sm:$0xff] %v933_v7  ;;  %966 = vst [vmem:[%s3386_s28 + $0xb8] sm:$0xff] %v934_v61  ;;  %v902_v19 = vadd.f32 %v870_v2, %v837_v17  ;;  %v903_v47 = vadd.f32 %v871_v52, %v838_v57  ;;  %v720_v44 = vpop.permute.xlu0 %719  ;;  %v1429_v15 = vpop.permute.xlu1 %1428  ;;  %v3582_v2 = vstv %s2010_s6 }
 0x17e   : > { %v745_v41 = vsel %vm731_vm0, %v720_v44, %v722_v22  ;;  %v809_v56 = vsel %vm731_vm0, %v722_v22, %v720_v44 }
 0x17f   : > { %v935_v33 = vadd.f32 %v3378_v59, %v902_v19  ;;  %v936_v31 = vadd.f32 %v3378_v59, %v903_v47  ;;  %v872_v48 = vmul.f32 %v3361_v36, %v745_v41  ;;  %v873_v51 = vmul.f32 %v3361_v36, %v809_v56 }
 0x181   : > { %967 = vst [vmem:[%s3386_s28 + $0xc0] sm:$0xff] %v935_v33  ;;  %968 = vst [vmem:[%s3386_s28 + $0xc8] sm:$0xff] %v936_v31  ;;  %v904_v12 = vadd.f32 %v872_v48, %v839_v21  ;;  %v905_v10 = vadd.f32 %v873_v51, %v840_v18  ;;  %v724_v54 = vpop.permute.xlu0 %723  ;;  %v1433_v62 = vpop.permute.xlu1 %1432 }
 0x182   : > { %v746_v45 = vsel %vm731_vm0, %v724_v54, %v726_v46  ;;  %v810_v22 = vsel %vm731_vm0, %v726_v46, %v724_v54  ;;  %v3558_v46 = vstv %s2008_s29 }
 0x183   : > { %v937_v39 = vadd.f32 %v3378_v59, %v904_v12  ;;  %v938_v30 = vadd.f32 %v3378_v59, %v905_v10  ;;  %v874_v34 = vmul.f32 %v3361_v36, %v746_v45  ;;  %v875_v43 = vmul.f32 %v3361_v36, %v810_v22 }
 0x184   : > { %v1571_v9 = vmul.f32 %v3558_v46, %v3182_v37  ;;  %v1574_v21 = vmul.f32 %v3558_v46, %v3198_v58  ;;  %v1576_v48 = vmul.f32 %v3558_v46, %v3216_v20  ;;  %v1575_v51 = vmul.f32 %v3558_v46, %v3223_v35 }
 0x185   : > { %969 = vst [vmem:[%s3386_s28 + $0xd0] sm:$0xff] %v937_v39  ;;  %970 = vst [vmem:[%s3386_s28 + $0xd8] sm:$0xff] %v938_v30  ;;  %v906_v13 = vadd.f32 %v874_v34, %v3103_v40  ;;  %v907_v23 = vadd.f32 %v875_v43, %v3042_v28  ;;  %v728_v29 = vpop.permute.xlu0 %727  ;;  %v1437_v8 = vpop.permute.xlu1 %1436  ;;  %v1578_v34 = vmul.f32 %v3558_v46, %v3233_v53 }
 0x186   : > { %v747_v38 = vsel %vm731_vm0, %v728_v29, %v730_v42  ;;  %v811_v49 = vsel %vm731_vm0, %v730_v42, %v728_v29  ;;  %v1572_v42 = vmul.f32 %v3558_v46, %v3174_v14  ;;  %v1577_v43 = vmul.f32 %v3558_v46, %v3238_v50 }
 0x187   : > { %v939_v0 = vadd.f32 %v3378_v59, %v906_v13  ;;  %v940_v5 = vadd.f32 %v3378_v59, %v907_v23  ;;  %v876_v57 = vmul.f32 %v3361_v36, %v747_v38  ;;  %v877_v17 = vmul.f32 %v3361_v36, %v811_v49 }
 0x189   : > { %971 = vst [vmem:[%s3386_s28 + $0xe0] sm:$0xff] %v939_v0  ;;  %972 = vst [vmem:[%s3386_s28 + $0xe8] sm:$0xff] %v940_v5  ;;  %v908_v28 = vadd.f32 %v876_v57, %v3110_v27  ;;  %v909_v40 = vadd.f32 %v877_v17, %v3075_v4  ;;  %v1427_v26 = vpop.permute.xlu0 %1426  ;;  %v1441_v16 = vpop.permute.xlu1 %1440  ;;  %v1580_v57 = vmul.f32 %v3558_v46, %v3246_v1 }
 0x18a   : > { %v1490_v36 = vsel %vm731_vm0, %v1427_v26, %v1429_v15  ;;  %v1554_v3 = vsel %vm731_vm0, %v1429_v15, %v1427_v26  ;;  %v1579_v17 = vmul.f32 %v3558_v46, %v3248_v11 }
 0x18b   : > { %v941_v7 = vadd.f32 %v3378_v59, %v908_v28  ;;  %v942_v61 = vadd.f32 %v3378_v59, %v909_v40  ;;  %v1604_v27 = vmul.f32 %v3566_v6, %v1490_v36  ;;  %v1605_v4 = vmul.f32 %v3566_v6, %v1554_v3 }
 0x18c   : > { %v1573_v59 = vmul.f32 %v3558_v46, %v3202_v63 }
 0x18d   : > { %973 = vst [vmem:[%s3386_s28 + $0xf0] sm:$0xff] %v941_v7  ;;  %974 = vst [vmem:[%s3386_s28 + $0xf8] sm:$0xff] %v942_v61  ;;  %v1636_v14 = vadd.f32 %v1604_v27, %v1571_v9  ;;  %v1637_v37 = vadd.f32 %v1605_v4, %v1572_v42  ;;  %v1431_v52 = vpop.permute.xlu0 %1430  ;;  %v1445_v18 = vpop.permute.xlu1 %1444  ;;  %v1582_v7 = vmul.f32 %v3558_v46, %v3257_v24 }
 0x18e   : > { %v1491_v19 = vsel %vm731_vm0, %v1431_v52, %v1433_v62  ;;  %v1555_v47 = vsel %vm731_vm0, %v1433_v62, %v1431_v52  ;;  %v1581_v61 = vmul.f32 %v3558_v46, %v3265_v25 }
 0x18f   : > { %v1669_v44 = vadd.f32 %v3582_v2, %v1636_v14  ;;  %v1670_v15 = vadd.f32 %v3582_v2, %v1637_v37  ;;  %v1606_v41 = vmul.f32 %v3566_v6, %v1491_v19  ;;  %v1607_v56 = vmul.f32 %v3566_v6, %v1555_v47  ;;  %v3966_v47 = vld [vmem:[#allocation16_spill] sm:$0xff] }
 0x190   : > { %v1584_v19 = vmul.f32 %v3558_v46, %v3267_v32 }
 0x191   : > { %2203 = vst [vmem:[%s3386_s28 + $0x100] sm:$0xff] %v1669_v44  ;;  %2204 = vst [vmem:[%s3386_s28 + $0x108] sm:$0xff] %v1670_v15  ;;  %v1638_v58 = vadd.f32 %v1606_v41, %v1573_v59  ;;  %v1639_v33 = vadd.f32 %v1607_v56, %v1574_v21  ;;  %v1435_v31 = vpop.permute.xlu0 %1434  ;;  %v1449_v63 = vpop.permute.xlu1 %1448  ;;  %v1583_v44 = vmul.f32 %v3558_v46, %v3966_v47 }
 0x192   : > { %v1492_v12 = vsel %vm731_vm0, %v1435_v31, %v1437_v8  ;;  %v1556_v10 = vsel %vm731_vm0, %v1437_v8, %v1435_v31 }
 0x193   : > { %v1671_v54 = vadd.f32 %v3582_v2, %v1638_v58  ;;  %v1672_v62 = vadd.f32 %v3582_v2, %v1639_v33  ;;  %v1608_v45 = vmul.f32 %v3566_v6, %v1492_v12  ;;  %v1609_v22 = vmul.f32 %v3566_v6, %v1556_v10  ;;  %v3968_v10 = vld [vmem:[#allocation18_spill] sm:$0xff] }
 0x195   : > { %2205 = vst [vmem:[%s3386_s28 + $0x110] sm:$0xff] %v1671_v54  ;;  %2206 = vst [vmem:[%s3386_s28 + $0x118] sm:$0xff] %v1672_v62  ;;  %v1640_v20 = vadd.f32 %v1608_v45, %v1575_v51  ;;  %v1641_v39 = vadd.f32 %v1609_v22, %v1576_v48  ;;  %v1439_v30 = vpop.permute.xlu0 %1438  ;;  %v1453_v35 = vpop.permute.xlu1 %1452  ;;  %v3967_v51 = vld [vmem:[#allocation15_spill] sm:$0xff]  ;;  %v1585_v54 = vmul.f32 %v3558_v46, %v3968_v10 }
 0x196   : > { %v1493_v13 = vsel %vm731_vm0, %v1439_v30, %v1441_v16  ;;  %v1557_v23 = vsel %vm731_vm0, %v1441_v16, %v1439_v30  ;;  %v1586_v12 = vmul.f32 %v3558_v46, %v3967_v51 }
 0x197   : > { %v1673_v29 = vadd.f32 %v3582_v2, %v1640_v20  ;;  %v1674_v8 = vadd.f32 %v3582_v2, %v1641_v39  ;;  %v1610_v38 = vmul.f32 %v3566_v6, %v1493_v13  ;;  %v1611_v49 = vmul.f32 %v3566_v6, %v1557_v23  ;;  %v3969_v23 = vld [vmem:[#allocation17_spill] sm:$0xff] }
 0x199   : > { %2207 = vst [vmem:[%s3386_s28 + $0x120] sm:$0xff] %v1673_v29  ;;  %2208 = vst [vmem:[%s3386_s28 + $0x128] sm:$0xff] %v1674_v8  ;;  %v1642_v53 = vadd.f32 %v1610_v38, %v1577_v43  ;;  %v1643_v0 = vadd.f32 %v1611_v49, %v1578_v34  ;;  %v1443_v5 = vpop.permute.xlu0 %1442  ;;  %v1457_v50 = vpop.permute.xlu1 %1456  ;;  %v1588_v29 = vmul.f32 %v3558_v46, %v3969_v23  ;;  %v3970_v8 = vld [vmem:[#allocation21_spill] sm:$0xff] }
 0x19a   : > { %v1494_v28 = vsel %vm731_vm0, %v1443_v5, %v1445_v18  ;;  %v1558_v40 = vsel %vm731_vm0, %v1445_v18, %v1443_v5  ;;  %v1587_v38 = vmul.f32 %v3558_v46, %v3970_v8 }
 0x19b   : > { %v1675_v26 = vadd.f32 %v3582_v2, %v1642_v53  ;;  %v1676_v16 = vadd.f32 %v3582_v2, %v1643_v0  ;;  %v1612_v42 = vmul.f32 %v3566_v6, %v1494_v28  ;;  %v1613_v9 = vmul.f32 %v3566_v6, %v1558_v40 }
 0x19d   : > { %2209 = vst [vmem:[%s3386_s28 + $0x130] sm:$0xff] %v1675_v26  ;;  %2210 = vst [vmem:[%s3386_s28 + $0x138] sm:$0xff] %v1676_v16  ;;  %v1644_v1 = vadd.f32 %v1612_v42, %v1579_v17  ;;  %v1645_v36 = vadd.f32 %v1613_v9, %v1580_v57  ;;  %v1447_v3 = vpop.permute.xlu0 %1446  ;;  %v1461_v11 = vpop.permute.xlu1 %1460  ;;  %v3971_v16 = vld [vmem:[#allocation19_spill] sm:$0xff] }
 0x19e   : > { %v1495_v27 = vsel %vm731_vm0, %v1447_v3, %v1449_v63  ;;  %v1559_v4 = vsel %vm731_vm0, %v1449_v63, %v1447_v3  ;;  %v1590_v42 = vmul.f32 %v3558_v46, %v3971_v16  ;;  %v3972_v9 = vld [vmem:[#allocation23_spill] sm:$0xff] }
 0x19f   : > { %v1677_v14 = vadd.f32 %v3582_v2, %v1644_v1  ;;  %v1678_v37 = vadd.f32 %v3582_v2, %v1645_v36  ;;  %v1614_v52 = vmul.f32 %v3566_v6, %v1495_v27  ;;  %v1615_v18 = vmul.f32 %v3566_v6, %v1559_v4 }
 0x1a0   : > { %v1589_v1 = vmul.f32 %v3558_v46, %v3972_v9 }
 0x1a1   : > { %2211 = vst [vmem:[%s3386_s28 + $0x140] sm:$0xff] %v1677_v14  ;;  %2212 = vst [vmem:[%s3386_s28 + $0x148] sm:$0xff] %v1678_v37  ;;  %v1646_v24 = vadd.f32 %v1614_v52, %v1581_v61  ;;  %v1647_v21 = vadd.f32 %v1615_v18, %v1582_v7  ;;  %v1451_v59 = vpop.permute.xlu0 %1450  ;;  %v1465_v25 = vpop.permute.xlu1 %1464  ;;  %v3973_v52 = vld [vmem:[#allocation20_spill] sm:$0xff] }
 0x1a2   : > { %v1496_v15 = vsel %vm731_vm0, %v1451_v59, %v1453_v35  ;;  %v1560_v41 = vsel %vm731_vm0, %v1453_v35, %v1451_v59  ;;  %v1592_v18 = vmul.f32 %v3558_v46, %v3973_v52 }
 0x1a3   : > { %v1679_v56 = vadd.f32 %v3582_v2, %v1646_v24  ;;  %v1680_v58 = vadd.f32 %v3582_v2, %v1647_v21  ;;  %v1616_v33 = vmul.f32 %v3566_v6, %v1496_v15  ;;  %v1617_v31 = vmul.f32 %v3566_v6, %v1560_v41  ;;  %v3974_v24 = vld [vmem:[#allocation25_spill] sm:$0xff] }
 0x1a4   : > { %v1591_v21 = vmul.f32 %v3558_v46, %v3974_v24 }
 0x1a5   : > { %2213 = vst [vmem:[%s3386_s28 + $0x150] sm:$0xff] %v1679_v56  ;;  %2214 = vst [vmem:[%s3386_s28 + $0x158] sm:$0xff] %v1680_v58  ;;  %v1648_v32 = vadd.f32 %v1616_v33, %v1583_v44  ;;  %v1649_v63 = vadd.f32 %v1617_v31, %v1584_v19  ;;  %v1455_v48 = vpop.permute.xlu0 %1454  ;;  %v1469_v35 = vpop.permute.xlu1 %1468  ;;  %v3975_v31 = vld [vmem:[#allocation22_spill] sm:$0xff] }
 0x1a6   : > { %v1497_v62 = vsel %vm731_vm0, %v1455_v48, %v1457_v50  ;;  %v1561_v45 = vsel %vm731_vm0, %v1457_v50, %v1455_v48 }
 0x1a7   : > { %v1681_v22 = vadd.f32 %v3582_v2, %v1648_v32  ;;  %v1682_v20 = vadd.f32 %v3582_v2, %v1649_v63  ;;  %v1618_v39 = vmul.f32 %v3566_v6, %v1497_v62  ;;  %v1619_v30 = vmul.f32 %v3566_v6, %v1561_v45 }
 0x1a8   : > { %v1594_v32 = vmul.f32 %v3558_v46, %v3975_v31  ;;  %v1593_v63 = vmul.f32 %v3558_v46, %v3329_v60 }
 0x1a9   : > { %2215 = vst [vmem:[%s3386_s28 + $0x160] sm:$0xff] %v1681_v22  ;;  %2216 = vst [vmem:[%s3386_s28 + $0x168] sm:$0xff] %v1682_v20  ;;  %v1650_v34 = vadd.f32 %v1618_v39, %v1585_v54  ;;  %v1651_v43 = vadd.f32 %v1619_v30, %v1586_v12  ;;  %v1459_v13 = vpop.permute.xlu0 %1458  ;;  %v1473_v40 = vpop.permute.xlu1 %1472  ;;  %v3976_v39 = vld [vmem:[#allocation24_spill] sm:$0xff] }
 0x1aa   : > { %v1498_v49 = vsel %vm731_vm0, %v1459_v13, %v1461_v11  ;;  %v1562_v53 = vsel %vm731_vm0, %v1461_v11, %v1459_v13  ;;  %v1596_v30 = vmul.f32 %v3558_v46, %v3976_v39  ;;  %v1777_v39 = vld [vmem:[%s3386_s28 + $0x50] sm:$0xff] (%p3983_p11) }
 0x1ab   : > { %v1683_v0 = vadd.f32 %v3582_v2, %v1650_v34  ;;  %v1684_v5 = vadd.f32 %v3582_v2, %v1651_v43  ;;  %v1620_v50 = vmul.f32 %v3566_v6, %v1498_v49  ;;  %v1621_v57 = vmul.f32 %v3566_v6, %v1562_v53  ;;  %1778 = vst [vmem:[%s3779_s25 + $0x50] sm:$0xff] (%p3983_p11), %v1777_v39 }
 0x1ad   : > { %2217 = vst [vmem:[%s3386_s28 + $0x170] sm:$0xff] %v1683_v0  ;;  %2218 = vst [vmem:[%s3386_s28 + $0x178] sm:$0xff] %v1684_v5  ;;  %v1652_v17 = vadd.f32 %v1620_v50, %v1587_v38  ;;  %v1653_v28 = vadd.f32 %v1621_v57, %v1588_v29  ;;  %v1463_v26 = vpop.permute.xlu0 %1462  ;;  %v1477_v44 = vpop.permute.xlu1 %1476  ;;  %v3978_v5 = vld [vmem:[#allocation26_spill] sm:$0xff] }
 0x1ae   : > { %v1499_v36 = vsel %vm731_vm0, %v1463_v26, %v1465_v25  ;;  %v1563_v3 = vsel %vm731_vm0, %v1465_v25, %v1463_v26  ;;  %v1598_v50 = vmul.f32 %v3558_v46, %v3978_v5  ;;  %v3979_v57 = vld [vmem:[#allocation30_spill] sm:$0xff] }
 0x1af   : > { %v1685_v11 = vadd.f32 %v3582_v2, %v1652_v17  ;;  %v1686_v7 = vadd.f32 %v3582_v2, %v1653_v28  ;;  %v1622_v61 = vmul.f32 %v3566_v6, %v1499_v36  ;;  %v1623_v27 = vmul.f32 %v3566_v6, %v1563_v3  ;;  %v1803_v5 = vld [vmem:[%s3386_s28 + $0xb8] sm:$0xff] (%p3983_p11) }
 0x1b0   : > { %v1597_v17 = vmul.f32 %v3558_v46, %v3979_v57  ;;  %1804 = vst [vmem:[%s3779_s25 + $0xb8] sm:$0xff] (%p3983_p11), %v1803_v5  ;;  %v1807_v57 = vld [vmem:[%s3386_s28 + $0xc8] sm:$0xff] (%p3983_p11) }
 0x1b1   : > { %2219 = vst [vmem:[%s3386_s28 + $0x180] sm:$0xff] %v1685_v11  ;;  %2220 = vst [vmem:[%s3386_s28 + $0x188] sm:$0xff] %v1686_v7  ;;  %v1654_v4 = vadd.f32 %v1622_v61, %v1589_v1  ;;  %v1655_v14 = vadd.f32 %v1623_v27, %v1590_v42  ;;  %v1467_v37 = vpop.permute.xlu0 %1466  ;;  %v1481_v45 = vpop.permute.xlu1 %1480  ;;  %v3980_v7 = vld [vmem:[#allocation27_spill] sm:$0xff] }
 0x1b2   : > { %v1500_v59 = vsel %vm731_vm0, %v1467_v37, %v1469_v35  ;;  %v1564_v25 = vsel %vm731_vm0, %v1469_v35, %v1467_v37  ;;  %v3977_v35 = vld [vmem:[#allocation28_spill] sm:$0xff]  ;;  %v1600_v61 = vmul.f32 %v3558_v46, %v3980_v7  ;;  %v3981_v27 = vld [vmem:[#allocation31_spill] sm:$0xff]  ;;  %1808 = vst [vmem:[%s3779_s25 + $0xc8] sm:$0xff] (%p3983_p11), %v1807_v57 }
 0x1b3   : > { %v1687_v19 = vadd.f32 %v3582_v2, %v1654_v4  ;;  %v1688_v47 = vadd.f32 %v3582_v2, %v1655_v14  ;;  %v1624_v15 = vmul.f32 %v3566_v6, %v1500_v59  ;;  %v1625_v41 = vmul.f32 %v3566_v6, %v1564_v25  ;;  %v1831_v7 = vld [vmem:[%s3386_s28 + $0x128] sm:$0xff] (%p3983_p11) }
 0x1b4   : > { %v1595_v34 = vmul.f32 %v3558_v46, %v3977_v35  ;;  %v1599_v4 = vmul.f32 %v3558_v46, %v3981_v27  ;;  %v1781_v35 = vld [vmem:[%s3386_s28 + $0x60] sm:$0xff] (%p3983_p11)  ;;  %1832 = vst [vmem:[%s3779_s25 + $0x228] sm:$0xff] (%p3983_p11), %v1831_v7  ;;  %v1835_v27 = vld [vmem:[%s3386_s28 + $0x138] sm:$0xff] (%p3983_p11) }
 0x1b5   : > { %2221 = vst [vmem:[%s3386_s28 + $0x190] sm:$0xff] %v1687_v19  ;;  %2222 = vst [vmem:[%s3386_s28 + $0x198] sm:$0xff] %v1688_v47  ;;  %v1656_v56 = vadd.f32 %v1624_v15, %v1591_v21  ;;  %v1657_v58 = vadd.f32 %v1625_v41, %v1592_v18  ;;  %v1471_v33 = vpop.permute.xlu0 %1470  ;;  %v1485_v26 = vpop.permute.xlu1 %1484  ;;  %v1601_v41 = vmul.f32 %v3558_v46, %v3376_v55 }
 0x1b6   : > { %v1501_v48 = vsel %vm731_vm0, %v1471_v33, %v1473_v40  ;;  %v1565_v51 = vsel %vm731_vm0, %v1473_v40, %v1471_v33  ;;  %1782 = vst [vmem:[%s3779_s25 + $0x60] sm:$0xff] (%p3983_p11), %v1781_v35  ;;  %1836 = vst [vmem:[%s3779_s25 + $0x238] sm:$0xff] (%p3983_p11), %v1835_v27 }
 0x1b7   : > { %v1689_v12 = vadd.f32 %v3582_v2, %v1656_v56  ;;  %v1690_v10 = vadd.f32 %v3582_v2, %v1657_v58  ;;  %v1626_v54 = vmul.f32 %v3566_v6, %v1501_v48  ;;  %v1627_v62 = vmul.f32 %v3566_v6, %v1565_v51 }
 0x1b9   : > { %2223 = vst [vmem:[%s3386_s28 + $0x1a0] sm:$0xff] %v1689_v12  ;;  %2224 = vst [vmem:[%s3386_s28 + $0x1a8] sm:$0xff] %v1690_v10  ;;  %v1658_v22 = vadd.f32 %v1626_v54, %v1593_v63  ;;  %v1659_v20 = vadd.f32 %v1627_v62, %v1594_v32  ;;  %v1475_v60 = vpop.permute.xlu0 %1474  ;;  %v1489_v59 = vpop.permute.xlu1 %1488  ;;  %v1761_v10 = vld [vmem:[%s3386_s28 + $0x10] sm:$0xff] (%p3983_p11)  ;;  %v1765_v54 = vld [vmem:[%s3386_s28 + $0x20] sm:$0xff] (%p3983_p11) }
 0x1ba   : > { %v1502_v43 = vsel %vm731_vm0, %v1475_v60, %v1477_v44  ;;  %v1566_v13 = vsel %vm731_vm0, %v1477_v44, %v1475_v60  ;;  %v3982_v44 = vld [vmem:[#allocation29_spill] sm:$0xff]  ;;  %v1767_v62 = vld [vmem:[%s3386_s28 + $0x28] sm:$0xff] (%p3983_p11)  ;;  %1762 = vst [vmem:[%s3779_s25 + $0x10] sm:$0xff] (%p3983_p11), %v1761_v10  ;;  %1766 = vst [vmem:[%s3779_s25 + $0x20] sm:$0xff] (%p3983_p11), %v1765_v54 }
 0x1bb   : > { %v1691_v23 = vadd.f32 %v3582_v2, %v1658_v22  ;;  %v1692_v29 = vadd.f32 %v3582_v2, %v1659_v20  ;;  %v1628_v8 = vmul.f32 %v3566_v6, %v1502_v43  ;;  %v1629_v38 = vmul.f32 %v3566_v6, %v1566_v13  ;;  %1768 = vst [vmem:[%s3779_s25 + $0x28] sm:$0xff] (%p3983_p11), %v1767_v62  ;;  %v1771_v22 = vld [vmem:[%s3386_s28 + $0x38] sm:$0xff] (%p3983_p11)  ;;  %v1773_v20 = vld [vmem:[%s3386_s28 + $0x40] sm:$0xff] (%p3983_p11)  ;;  %v1775_v60 = vld [vmem:[%s3386_s28 + $0x48] sm:$0xff] (%p3983_p11) }
 0x1bc   : > { %v1602_v15 = vmul.f32 %v3558_v46, %v3982_v44  ;;  %v1757_v46 = vld [vmem:[%s3386_s28] sm:$0xff] (%p3983_p11)  ;;  %1772 = vst [vmem:[%s3779_s25 + $0x38] sm:$0xff] (%p3983_p11), %v1771_v22  ;;  %1774 = vst [vmem:[%s3779_s25 + $0x40] sm:$0xff] (%p3983_p11), %v1773_v20  ;;  %v1785_v43 = vld [vmem:[%s3386_s28 + $0x70] sm:$0xff] (%p3983_p11) }
 0x1bd   : > { %2225 = vst [vmem:[%s3386_s28 + $0x1b0] sm:$0xff] %v1691_v23  ;;  %2226 = vst [vmem:[%s3386_s28 + $0x1b8] sm:$0xff] %v1692_v29  ;;  %v1660_v49 = vadd.f32 %v1628_v8, %v1595_v34  ;;  %v1661_v53 = vadd.f32 %v1629_v38, %v1596_v30  ;;  %v1479_v0 = vpop.permute.xlu0 %1478  ;;  %v1779_v30 = vld [vmem:[%s3386_s28 + $0x58] sm:$0xff] (%p3983_p11)  ;;  %v1783_v34 = vld [vmem:[%s3386_s28 + $0x68] sm:$0xff] (%p3983_p11) }
 0x1be   : > { %v1503_v28 = vsel %vm731_vm0, %v1479_v0, %v1481_v45  ;;  %v1567_v40 = vsel %vm731_vm0, %v1481_v45, %v1479_v0  ;;  %1758 = vst [vmem:[%s3779_s25] sm:$0xff] (%p3983_p11), %v1757_v46  ;;  %v1769_v45 = vld [vmem:[%s3386_s28 + $0x30] sm:$0xff] (%p3983_p11)  ;;  %1776 = vst [vmem:[%s3779_s25 + $0x48] sm:$0xff] (%p3983_p11), %v1775_v60  ;;  %v1787_v13 = vld [vmem:[%s3386_s28 + $0x78] sm:$0xff] (%p3983_p11) }
 0x1bf   : > { %v1693_v16 = vadd.f32 %v3582_v2, %v1660_v49  ;;  %v1694_v42 = vadd.f32 %v3582_v2, %v1661_v53  ;;  %v1630_v9 = vmul.f32 %v3566_v6, %v1503_v28  ;;  %v1631_v1 = vmul.f32 %v3566_v6, %v1567_v40  ;;  %1770 = vst [vmem:[%s3779_s25 + $0x30] sm:$0xff] (%p3983_p11), %v1769_v45  ;;  %v1789_v23 = vld [vmem:[%s3386_s28 + $0x80] sm:$0xff] (%p3983_p11)  ;;  %v1791_v29 = vld [vmem:[%s3386_s28 + $0x88] sm:$0xff] (%p3983_p11)  ;;  %v1793_v8 = vld [vmem:[%s3386_s28 + $0x90] sm:$0xff] (%p3983_p11) }
 0x1c0   : > { %1780 = vst [vmem:[%s3779_s25 + $0x58] sm:$0xff] (%p3983_p11), %v1779_v30  ;;  %1784 = vst [vmem:[%s3779_s25 + $0x68] sm:$0xff] (%p3983_p11), %v1783_v34  ;;  %v1795_v38 = vld [vmem:[%s3386_s28 + $0x98] sm:$0xff] (%p3983_p11)  ;;  %v1797_v49 = vld [vmem:[%s3386_s28 + $0xa0] sm:$0xff] (%p3983_p11) }
 0x1c1   : > { %2227 = vst [vmem:[%s3386_s28 + $0x1c0] sm:$0xff] %v1693_v16  ;;  %2228 = vst [vmem:[%s3386_s28 + $0x1c8] sm:$0xff] %v1694_v42  ;;  %v1662_v36 = vadd.f32 %v1630_v9, %v1597_v17  ;;  %v1663_v3 = vadd.f32 %v1631_v1, %v1598_v50  ;;  %v1483_v11 = vpop.permute.xlu0 %1482  ;;  %v1799_v53 = vld [vmem:[%s3386_s28 + $0xa8] sm:$0xff] (%p3983_p11)  ;;  %v1801_v0 = vld [vmem:[%s3386_s28 + $0xb0] sm:$0xff] (%p3983_p11) }
 0x1c2   : > { %v1504_v14 = vsel %vm731_vm0, %v1483_v11, %v1485_v26  ;;  %v1568_v37 = vsel %vm731_vm0, %v1485_v26, %v1483_v11  ;;  %1786 = vst [vmem:[%s3779_s25 + $0x70] sm:$0xff] (%p3983_p11), %v1785_v43  ;;  %1788 = vst [vmem:[%s3779_s25 + $0x78] sm:$0xff] (%p3983_p11), %v1787_v13  ;;  %v1805_v50 = vld [vmem:[%s3386_s28 + $0xc0] sm:$0xff] (%p3983_p11)  ;;  %v1809_v17 = vld [vmem:[%s3386_s28 + $0xd0] sm:$0xff] (%p3983_p11) }
 0x1c3   : > { %v1695_v52 = vadd.f32 %v3582_v2, %v1662_v36  ;;  %v1696_v18 = vadd.f32 %v3582_v2, %v1663_v3  ;;  %v1632_v24 = vmul.f32 %v3566_v6, %v1504_v14  ;;  %v1633_v21 = vmul.f32 %v3566_v6, %v1568_v37  ;;  %1790 = vst [vmem:[%s3779_s25 + $0x80] sm:$0xff] (%p3983_p11), %v1789_v23  ;;  %v1811_v28 = vld [vmem:[%s3386_s28 + $0xd8] sm:$0xff] (%p3983_p11)  ;;  %v1813_v40 = vld [vmem:[%s3386_s28 + $0xe0] sm:$0xff] (%p3983_p11)  ;;  %v1815_v26 = vld [vmem:[%s3386_s28 + $0xe8] sm:$0xff] (%p3983_p11) }
 0x1c4   : > { %1792 = vst [vmem:[%s3779_s25 + $0x88] sm:$0xff] (%p3983_p11), %v1791_v29  ;;  %1794 = vst [vmem:[%s3779_s25 + $0x90] sm:$0xff] (%p3983_p11), %v1793_v8  ;;  %v1817_v16 = vld [vmem:[%s3386_s28 + $0xf0] sm:$0xff] (%p3983_p11)  ;;  %v1819_v42 = vld [vmem:[%s3386_s28 + $0xf8] sm:$0xff] (%p3983_p11) }
 0x1c5   : > { %2229 = vst [vmem:[%s3386_s28 + $0x1d0] sm:$0xff] %v1695_v52  ;;  %2230 = vst [vmem:[%s3386_s28 + $0x1d8] sm:$0xff] %v1696_v18  ;;  %v1664_v25 = vadd.f32 %v1632_v24, %v1599_v4  ;;  %v1665_v19 = vadd.f32 %v1633_v21, %v1600_v61  ;;  %v1487_v47 = vpop.permute.xlu0 %1486  ;;  %v1821_v9 = vld [vmem:[%s3386_s28 + $0x100] sm:$0xff] (%p3983_p11)  ;;  %v1823_v1 = vld [vmem:[%s3386_s28 + $0x108] sm:$0xff] (%p3983_p11) }
 0x1c6   : > { %v1505_v56 = vsel %vm731_vm0, %v1487_v47, %v1489_v59  ;;  %v1569_v58 = vsel %vm731_vm0, %v1489_v59, %v1487_v47  ;;  %1796 = vst [vmem:[%s3779_s25 + $0x98] sm:$0xff] (%p3983_p11), %v1795_v38  ;;  %1798 = vst [vmem:[%s3779_s25 + $0xa0] sm:$0xff] (%p3983_p11), %v1797_v49  ;;  %v1825_v36 = vld [vmem:[%s3386_s28 + $0x110] sm:$0xff] (%p3983_p11)  ;;  %v1827_v3 = vld [vmem:[%s3386_s28 + $0x118] sm:$0xff] (%p3983_p11) }
 0x1c7   : > { %v1697_v33 = vadd.f32 %v3582_v2, %v1664_v25  ;;  %v1698_v31 = vadd.f32 %v3582_v2, %v1665_v19  ;;  %v1634_v32 = vmul.f32 %v3566_v6, %v1505_v56  ;;  %v1635_v63 = vmul.f32 %v3566_v6, %v1569_v58  ;;  %1740 = sbr.rel (!%p3983_p11) target bundleno = 478 (0x1de), region = 48  ;;  %v1759_v6 = vld [vmem:[%s3386_s28 + $0x8] sm:$0xff] (%p3983_p11)  ;;  %1800 = vst [vmem:[%s3779_s25 + $0xa8] sm:$0xff] (%p3983_p11), %v1799_v53  ;;  %v1829_v11 = vld [vmem:[%s3386_s28 + $0x120] sm:$0xff] (%p3983_p11)  ;;  %v1833_v61 = vld [vmem:[%s3386_s28 + $0x130] sm:$0xff] (%p3983_p11) }
 0x1c8   : > { %1760 = vst [vmem:[%s3779_s25 + $0x8] sm:$0xff] (%p3983_p11), %v1759_v6  ;;  %1802 = vst [vmem:[%s3779_s25 + $0xb0] sm:$0xff] (%p3983_p11), %v1801_v0  ;;  %v1837_v4 = vld [vmem:[%s3386_s28 + $0x140] sm:$0xff] (%p3983_p11)  ;;  %v1839_v14 = vld [vmem:[%s3386_s28 + $0x148] sm:$0xff] (%p3983_p11) }
 0x1c9   : > { %2231 = vst [vmem:[%s3386_s28 + $0x1e0] sm:$0xff] %v1697_v33  ;;  %2232 = vst [vmem:[%s3386_s28 + $0x1e8] sm:$0xff] %v1698_v31  ;;  %v1666_v48 = vadd.f32 %v1634_v32, %v1601_v41  ;;  %v1667_v51 = vadd.f32 %v1635_v63, %v1602_v15  ;;  %v1841_v37 = vld [vmem:[%s3386_s28 + $0x150] sm:$0xff] (%p3983_p11)  ;;  %v1843_v52 = vld [vmem:[%s3386_s28 + $0x158] sm:$0xff] (%p3983_p11) }
 0x1ca   : > { %1806 = vst [vmem:[%s3779_s25 + $0xc0] sm:$0xff] (%p3983_p11), %v1805_v50  ;;  %1810 = vst [vmem:[%s3779_s25 + $0xd0] sm:$0xff] (%p3983_p11), %v1809_v17  ;;  %v1845_v18 = vld [vmem:[%s3386_s28 + $0x160] sm:$0xff] (%p3983_p11)  ;;  %v1847_v24 = vld [vmem:[%s3386_s28 + $0x168] sm:$0xff] (%p3983_p11) }
 0x1cb   : > { %v1699_v12 = vadd.f32 %v3582_v2, %v1666_v48  ;;  %v1700_v55 = vadd.f32 %v3582_v2, %v1667_v51  ;;  %v1763_v2 = vld [vmem:[%s3386_s28 + $0x18] sm:$0xff] (%p3983_p11)  ;;  %1812 = vst [vmem:[%s3779_s25 + $0xd8] sm:$0xff] (%p3983_p11), %v1811_v28  ;;  %1814 = vst [vmem:[%s3779_s25 + $0xe0] sm:$0xff] (%p3983_p11), %v1813_v40  ;;  %v1849_v21 = vld [vmem:[%s3386_s28 + $0x170] sm:$0xff] (%p3983_p11) }
 0x1cc   : > { %1764 = vst [vmem:[%s3779_s25 + $0x18] sm:$0xff] (%p3983_p11), %v1763_v2  ;;  %1816 = vst [vmem:[%s3779_s25 + $0xe8] sm:$0xff] (%p3983_p11), %v1815_v26  ;;  %v1851_v59 = vld [vmem:[%s3386_s28 + $0x178] sm:$0xff] (%p3983_p11)  ;;  %v1853_v25 = vld [vmem:[%s3386_s28 + $0x180] sm:$0xff] (%p3983_p11) }
 0x1cd   : > { %2233 = vst [vmem:[%s3386_s28 + $0x1f0] sm:$0xff] %v1699_v12  ;;  %2234 = vst [vmem:[%s3386_s28 + $0x1f8] sm:$0xff] %v1700_v55  ;;  %v1855_v19 = vld [vmem:[%s3386_s28 + $0x188] sm:$0xff] (%p3983_p11)  ;;  %v1857_v47 = vld [vmem:[%s3386_s28 + $0x190] sm:$0xff] (%p3983_p11) }
 0x1ce   : > { %1818 = vst [vmem:[%s3779_s25 + $0xf0] sm:$0xff] %v1817_v16  ;;  %1820 = vst [vmem:[%s3779_s25 + $0xf8] sm:$0xff] %v1819_v42  ;;  %v1859_v44 = vld [vmem:[%s3386_s28 + $0x198] sm:$0xff]  ;;  %v1861_v15 = vld [vmem:[%s3386_s28 + $0x1a0] sm:$0xff] }
 0x1cf   : > { %1822 = vst [vmem:[%s3779_s25 + $0x200] sm:$0xff] %v1821_v9  ;;  %1824 = vst [vmem:[%s3779_s25 + $0x208] sm:$0xff] %v1823_v1  ;;  %v1863_v41 = vld [vmem:[%s3386_s28 + $0x1a8] sm:$0xff]  ;;  %v1865_v56 = vld [vmem:[%s3386_s28 + $0x1b0] sm:$0xff] }
 0x1d0   : > { %1826 = vst [vmem:[%s3779_s25 + $0x210] sm:$0xff] %v1825_v36  ;;  %1828 = vst [vmem:[%s3779_s25 + $0x218] sm:$0xff] %v1827_v3  ;;  %v1867_v58 = vld [vmem:[%s3386_s28 + $0x1b8] sm:$0xff]  ;;  %v1869_v33 = vld [vmem:[%s3386_s28 + $0x1c0] sm:$0xff] }
 0x1d1   : > { %1830 = vst [vmem:[%s3779_s25 + $0x220] sm:$0xff] %v1829_v11  ;;  %1834 = vst [vmem:[%s3779_s25 + $0x230] sm:$0xff] %v1833_v61  ;;  %v1871_v31 = vld [vmem:[%s3386_s28 + $0x1c8] sm:$0xff]  ;;  %v1873_v32 = vld [vmem:[%s3386_s28 + $0x1d0] sm:$0xff] }
 0x1d2   : > { %1838 = vst [vmem:[%s3779_s25 + $0x240] sm:$0xff] %v1837_v4  ;;  %1840 = vst [vmem:[%s3779_s25 + $0x248] sm:$0xff] %v1839_v14  ;;  %v1875_v63 = vld [vmem:[%s3386_s28 + $0x1d8] sm:$0xff]  ;;  %v1877_v48 = vld [vmem:[%s3386_s28 + $0x1e0] sm:$0xff] }
 0x1d3   : > { %1842 = vst [vmem:[%s3779_s25 + $0x250] sm:$0xff] %v1841_v37  ;;  %1844 = vst [vmem:[%s3779_s25 + $0x258] sm:$0xff] %v1843_v52  ;;  %v1879_v51 = vld [vmem:[%s3386_s28 + $0x1e8] sm:$0xff] }
 0x1d4   : > { %1846 = vst [vmem:[%s3779_s25 + $0x260] sm:$0xff] %v1845_v18  ;;  %1848 = vst [vmem:[%s3779_s25 + $0x268] sm:$0xff] %v1847_v24  ;;  %v1881_v12 = vld [vmem:[%s3386_s28 + $0x1f0] sm:$0xff]  ;;  %v1883_v55 = vld [vmem:[%s3386_s28 + $0x1f8] sm:$0xff] }
 0x1d5   : > { %1850 = vst [vmem:[%s3779_s25 + $0x270] sm:$0xff] %v1849_v21  ;;  %1852 = vst [vmem:[%s3779_s25 + $0x278] sm:$0xff] %v1851_v59 }
 0x1d6   : > { %1854 = vst [vmem:[%s3779_s25 + $0x280] sm:$0xff] %v1853_v25  ;;  %1856 = vst [vmem:[%s3779_s25 + $0x288] sm:$0xff] %v1855_v19 }
 0x1d7   : > { %1858 = vst [vmem:[%s3779_s25 + $0x290] sm:$0xff] %v1857_v47  ;;  %1860 = vst [vmem:[%s3779_s25 + $0x298] sm:$0xff] %v1859_v44 }
 0x1d8   : > { %1862 = vst [vmem:[%s3779_s25 + $0x2a0] sm:$0xff] %v1861_v15  ;;  %1864 = vst [vmem:[%s3779_s25 + $0x2a8] sm:$0xff] %v1863_v41 }
 0x1d9   : > { %1866 = vst [vmem:[%s3779_s25 + $0x2b0] sm:$0xff] %v1865_v56  ;;  %1868 = vst [vmem:[%s3779_s25 + $0x2b8] sm:$0xff] %v1867_v58 }
 0x1da   : > { %1870 = vst [vmem:[%s3779_s25 + $0x2c0] sm:$0xff] %v1869_v33  ;;  %1872 = vst [vmem:[%s3779_s25 + $0x2c8] sm:$0xff] %v1871_v31 }
 0x1db   : > { %1874 = vst [vmem:[%s3779_s25 + $0x2d0] sm:$0xff] %v1873_v32  ;;  %1876 = vst [vmem:[%s3779_s25 + $0x2d8] sm:$0xff] %v1875_v63 }
 0x1dc   : > { %1878 = vst [vmem:[%s3779_s25 + $0x2e0] sm:$0xff] %v1877_v48  ;;  %1880 = vst [vmem:[%s3779_s25 + $0x2e8] sm:$0xff] %v1879_v51 }
 0x1dd   : > { %1882 = vst [vmem:[%s3779_s25 + $0x2f0] sm:$0xff] %v1881_v12  ;;  %1884 = vst [vmem:[%s3779_s25 + $0x2f8] sm:$0xff] %v1883_v55 }
 0x1de PF: > { %p17_p1 = scmp.ge.s32.totalorder %s2448_s17, 4   ;;  %s3984_s12 = smov %s2385_s13 }
 0x1df   : > { %s3985_s13 = smov %s2389_s14  ;;  %s3986_s14 = smov %s2458_s20 }
 0x1e0   : > { %s3987_s15 = smov %s2448_s17  ;;  %19 = sbr.rel (!%p17_p1) target bundleno = 6 (0x6), region = 125 }
 0x1e7   :  { %1900 = vsyncpa [#allocation3], 1 }
 0x1e8   :  { %1902 = vsyncpa [#allocation3 + $0x1], 1 }
 0x1e9   :  { %1903 = vsyncpa [#allocation7], 1 }
 0x1ea   :  { %1905 = vsyncpa [#allocation7 + $0x1], 1 }
 0x1eb   :  { %1906 = vsyncpa [#allocation4], 1 }
 0x1ec   :  { %1908 = vsyncpa [#allocation4 + $0x1], 1 }

</bundles_post_ra>
